<compile_context>
chip_gen: v6e
topology: v6e:2x2x1
jax: 0.10.0
libtpu: 0.0.40
codegen_flags: <defaults>
</compile_context>

<pallas_src>
import functools

import jax
import jax.numpy as jnp
from jax.experimental import pallas as pl
from jax.experimental.pallas import tpu as pltpu


def _round_up(x, m):
    return ((x + m - 1) // m) * m


# ---------------------------------------------------------------------------
# Pallas kernel:  out = act( sum_r  concat_c(shift_{r,c}(x)) @ W_r + b )
# ---------------------------------------------------------------------------
def _conv_gemm_kernel(x_ref, w_ref, b_ref, o_ref, *,
                      row_offsets, ncol, block_m, activation):
    # x_ref : (S_pad, Cin)      flattened padded image (resident per batch elem)
    # w_ref : (KH, ncol*Cin, tn) row-tap-major weights (bf16)
    # b_ref : (1, tn)           bias (f32)
    # o_ref : (tm, tn)          output tile
    base = pl.multiple_of(pl.program_id(2) * block_m, 8)
    acc = None
    for r, roff in enumerate(row_offsets):
        if ncol == 1:
            a = x_ref[pl.ds(base + roff, block_m), :]
        else:
            # column taps merged into K: lane-concat of the shifted slices
            a = jnp.concatenate(
                [x_ref[pl.ds(base + roff + c, block_m), :] for c in range(ncol)],
                axis=-1)
        part = jnp.dot(a.astype(jnp.bfloat16), w_ref[r],
                       preferred_element_type=jnp.float32)
        acc = part if acc is None else acc + part     # register-resident chain
    out = acc + b_ref[...]
    if activation == "relu":
        out = jnp.maximum(out, 0.0)
    elif activation == "sigmoid":
        out = jax.nn.sigmoid(out)
    o_ref[...] = out.astype(o_ref.dtype)


def conv2d_gemm(x, w_taps, bias, *, kh, kw, pads, activation,
                in_scale=None, in_mean=None,
                out_dtype=jnp.float32, tm_cap=256, tn_cap=128):
    """Stride-1 2-D conv with fused in-kernel im2col, bias, activation and
    (optionally) a folded per-input-channel BatchNorm affine.

    x:        (N, H, W, Cin)     NHWC activation (pre-BN if in_scale given)
    w_taps:   (kh*kw, Cin, Cout) tap-major weights (tap = ki*kw + kj)
    bias:     (Cout,)
    pads:     (top, bottom, left, right) padding of the *bn output* with zeros
    in_scale: (Cin,)  rsqrt(var+eps) of the folded BatchNorm (or None)
    in_mean:  (Cin,)  mean of the folded BatchNorm (or None)
    returns   (N, Ho, Wo, Cout)
    """
    N, H, W, Cin = x.shape
    T, Cin2, Cout = w_taps.shape
    assert T == kh * kw and Cin2 == Cin
    pt, pb, p_l, p_r = pads
    Hp, Wp = H + pt + pb, W + p_l + p_r
    Ho, Wo = Hp - kh + 1, Wp - kw + 1

    # --- fold BatchNorm: bn(y) = (y - mean)*scale.  Scale folds into W over
    # Cin, the shift folds into the bias, and the input is padded with `mean`
    # so padded positions behave exactly like zero-valued bn outputs.
    w_taps = w_taps.astype(jnp.float32)
    bias = bias.astype(jnp.float32)
    pad_val = None
    if in_scale is not None:
        w_taps = w_taps * in_scale.astype(jnp.float32)[None, :, None]
        bias = bias - jnp.einsum("tio,i->o", w_taps, in_mean.astype(jnp.float32))
        pad_val = in_mean.astype(jnp.float32)

    # --- merge the kw column taps into the K dimension (lane-aligned Cin only)
    merge_cols = (kw > 1) and (Cin % 128 == 0)
    if merge_cols:
        ncol = kw
        wk = w_taps.reshape(kh, kw * Cin, Cout)
        row_offsets = tuple(ki * Wp for ki in range(kh))
    else:
        ncol = 1
        wk = w_taps
        row_offsets = tuple(ki * Wp + kj for ki in range(kh) for kj in range(kw))
    KH, Kdim = wk.shape[0], wk.shape[1]

    # --- GEMM geometry: rows = flattened (Ho, Wp) grid; (Wp - Wo) junk
    # columns per output row are computed and sliced away, which keeps every
    # tap a contiguous shifted window of the flattened padded image.
    R = Ho * Wp
    n_m = pl.cdiv(R, tm_cap)
    tm = _round_up(pl.cdiv(R, n_m), 8)                  # adapt tile to true M
    R_pad = n_m * tm
    tn = tn_cap if Cout % tn_cap == 0 else Cout

    max_off = (kh - 1) * Wp + (kw - 1)
    S_pad = _round_up(max(R_pad + max_off, Hp * Wp), 8)

    # --- padded, flattened input (single HBM copy)
    if pad_val is not None and (pt or pb or p_l or p_r):
        xp = jnp.broadcast_to(pad_val.reshape(1, 1, 1, Cin), (N, Hp, Wp, Cin))
        xp = jax.lax.dynamic_update_slice(xp, x.astype(jnp.float32),
                                          (0, pt, p_l, 0))
    else:
        xp = jnp.pad(x.astype(jnp.float32),
                     ((0, 0), (pt, pb), (p_l, p_r), (0, 0)))
    xp = xp.reshape(N, Hp * Wp, Cin)
    xp = jnp.pad(xp, ((0, 0), (0, S_pad - Hp * Wp), (0, 0)))
    wt = wk.astype(jnp.bfloat16)                        # bf16 MXU operand
    b2 = bias.reshape(1, Cout)

    # Grid (N, j, m): m innermost so the weight tile is fetched once per j.
    grid = (N, Cout // tn, R_pad // tm)

    out = pl.pallas_call(
        functools.partial(_conv_gemm_kernel, row_offsets=row_offsets,
                          ncol=ncol, block_m=tm, activation=activation),
        out_shape=jax.ShapeDtypeStruct((N, R_pad, Cout), out_dtype),
        grid_spec=pltpu.PrefetchScalarGridSpec(
            num_scalar_prefetch=0,
            grid=grid,
            in_specs=[
                # whole flattened image; block index constant over (j, m) so
                # it stays resident in VMEM while weight/output tiles cycle.
                # TODO(synk): for very large inputs switch to memory_space=
                # pl.ANY + a manually double-buffered (tm + max_off)-row DMA
                # window (and Buffered(1)) to bound VMEM independent of H*W.
                pl.BlockSpec((None, S_pad, Cin), lambda n, j, m: (n, 0, 0)),
                pl.BlockSpec((KH, Kdim, tn), lambda n, j, m: (0, 0, j)),
                pl.BlockSpec((1, tn), lambda n, j, m: (0, j)),
            ],
            out_specs=pl.BlockSpec((None, tm, tn), lambda n, j, m: (n, m, j)),
        ),
        compiler_params=pltpu.CompilerParams(
            dimension_semantics=("parallel", "parallel", "parallel"),
            vmem_limit_bytes=48 * 1024 * 1024),
    )(xp, wt, b2)

    out = out[:, :R, :].reshape(N, Ho, Wp, Cout)[:, :, :Wo, :]
    return out


# ---------------------------------------------------------------------------
# Layer wrappers built on the fused conv GEMM
# ---------------------------------------------------------------------------
def conv3x3(x, w, b, activation="relu", in_scale=None, in_mean=None):
    """Conv2d(k=3, s=1, p=1) + activation.  w: (Cout, Cin, 3, 3)."""
    Cout, Cin = w.shape[0], w.shape[1]
    w_taps = jnp.transpose(w, (2, 3, 1, 0)).reshape(9, Cin, Cout)
    return conv2d_gemm(x, w_taps, b, kh=3, kw=3, pads=(1, 1, 1, 1),
                       activation=activation, in_scale=in_scale,
                       in_mean=in_mean)


def deconv3x3_s2(x, w, b, activation="relu", in_scale=None, in_mean=None):
    """ConvTranspose2d(k=3, s=2, p=1, output_padding=1) + activation.

    Sub-pixel decomposition: one 2x2 conv (input padded by 1 on bottom/right)
    producing 4*Cout phase channels, then depth-to-space.
    w: (Cin, Cout, 3, 3) PyTorch ConvTranspose layout.
    """
    N, H, W, Cin = x.shape
    Cout = w.shape[1]
    wf = w[:, :, ::-1, ::-1]

    def wc(ki, kj):
        return wf[:, :, ki, kj]                 # (Cin, Cout)

    z = jnp.zeros((Cin, Cout), w.dtype)
    # phase p = (row parity)*2 + (col parity)
    tap00 = jnp.concatenate([wc(1, 1), wc(1, 0), wc(0, 1), wc(0, 0)], axis=1)
    tap01 = jnp.concatenate([z,        wc(1, 2), z,        wc(0, 2)], axis=1)
    tap10 = jnp.concatenate([z,        z,        wc(2, 1), wc(2, 0)], axis=1)
    tap11 = jnp.concatenate([z,        z,        z,        wc(2, 2)], axis=1)
    # TODO(synk): ~44% of this packed 2x2 GEMM is structural zeros; a
    # per-phase K split (Cin / 2Cin / 2Cin / 4Cin) would remove it at the
    # cost of four output lane-slices per tile.
    w_taps = jnp.stack([tap00, tap01, tap10, tap11], axis=0)  # (4, Cin, 4*Cout)
    b4 = jnp.tile(b, 4)

    y = conv2d_gemm(x, w_taps, b4, kh=2, kw=2, pads=(0, 1, 0, 1),
                    activation=activation, in_scale=in_scale, in_mean=in_mean)
    # depth-to-space: channels [p0|p1|p2|p3] -> 2x2 spatial interleave
    y = y.reshape(N, H, W, 2, 2, Cout)
    y = jnp.transpose(y, (0, 1, 3, 2, 4, 5)).reshape(N, 2 * H, 2 * W, Cout)
    return y


def conv1x1_sigmoid(x, w, b, in_scale=None, in_mean=None):
    """Classifier: 1x1 conv + sigmoid; Cout padded to 128 lanes for dense
    stores at full resolution (zero weight columns, sliced back outside)."""
    Cout, Cin = w.shape[0], w.shape[1]
    Cout_p = max(128, _round_up(Cout, 128))
    w_taps = jnp.transpose(w.reshape(Cout, Cin))[None]          # (1, Cin, Cout)
    w_taps = jnp.pad(w_taps, ((0, 0), (0, 0), (0, Cout_p - Cout)))
    b_p = jnp.pad(b, (0, Cout_p - Cout))
    y = conv2d_gemm(x, w_taps, b_p, kh=1, kw=1, pads=(0, 0, 0, 0),
                    activation="sigmoid", in_scale=in_scale, in_mean=in_mean)
    return y[..., :Cout]


def maxpool2(x):
    N, H, W, C = x.shape
    return x.reshape(N, H // 2, 2, W // 2, 2, C).max(axis=(2, 4))


def bn_stats(x, eps=1e-5):
    """Training-mode nn.BatchNorm2d statistics (gamma=1, beta=0): returns the
    per-channel (mean, rsqrt(biased_var + eps)) that get folded into the
    consuming conv/deconv."""
    x32 = x.astype(jnp.float32)
    mean = x32.mean(axis=(0, 1, 2))
    var = x32.var(axis=(0, 1, 2))
    return mean, jax.lax.rsqrt(var + eps)


# ---------------------------------------------------------------------------
# FCN8s (VGG11 encoder) forward
# ---------------------------------------------------------------------------
VGG11_CONVS = [(3, 64), (64, 128), (128, 256), (256, 256),
               (256, 512), (512, 512), (512, 512), (512, 512)]
DECONVS = [(512, 512), (512, 256), (256, 128), (128, 64), (64, 32)]


def init_params(key, n_class):
    params = {}
    scale = 0.05
    for i, (cin, cout) in enumerate(VGG11_CONVS):
        key, k1, k2 = jax.random.split(key, 3)
        params[f"c{i}_w"] = scale * jax.random.normal(k1, (cout, cin, 3, 3), jnp.float32)
        params[f"c{i}_b"] = scale * jax.random.normal(k2, (cout,), jnp.float32)
    for i, (cin, cout) in enumerate(DECONVS, start=1):
        key, k1, k2 = jax.random.split(key, 3)
        # ConvTranspose2d weight layout: (Cin, Cout, kH, kW)
        params[f"d{i}_w"] = scale * jax.random.normal(k1, (cin, cout, 3, 3), jnp.float32)
        params[f"d{i}_b"] = scale * jax.random.normal(k2, (cout,), jnp.float32)
    key, k1, k2 = jax.random.split(key, 3)
    params["cls_w"] = scale * jax.random.normal(k1, (n_class, 32, 1, 1), jnp.float32)
    params["cls_b"] = scale * jax.random.normal(k2, (n_class,), jnp.float32)
    return params


def fcn8s_forward(params, x_nchw):
    x = jnp.transpose(x_nchw, (0, 2, 3, 1)).astype(jnp.float32)   # NCHW -> NHWC

    # --- VGG11 encoder (only x3, x4, x5 feed the decoder) ---
    x = conv3x3(x, params["c0_w"], params["c0_b"]); x = maxpool2(x)
    x = conv3x3(x, params["c1_w"], params["c1_b"]); x = maxpool2(x)
    x = conv3x3(x, params["c2_w"], params["c2_b"])
    x = conv3x3(x, params["c3_w"], params["c3_b"]); x = maxpool2(x); x3 = x
    x = conv3x3(x, params["c4_w"], params["c4_b"])
    x = conv3x3(x, params["c5_w"], params["c5_b"]); x = maxpool2(x); x4 = x
    x = conv3x3(x, params["c6_w"], params["c6_b"])
    x = conv3x3(x, params["c7_w"], params["c7_b"]); x = maxpool2(x); x5 = x

    # --- decoder: each BatchNorm (train-mode batch stats) is folded into the
    # conv/deconv that consumes it, so the normalized tensor never hits HBM.
    y = deconv3x3_s2(x5, params["d1_w"], params["d1_b"], "relu")         # relu(deconv1(x5))
    pre = y + x4                                                         # bn1 input
    m, s = bn_stats(pre)
    y = deconv3x3_s2(pre, params["d2_w"], params["d2_b"], "relu", s, m)  # relu(deconv2(bn1))
    pre = y + x3                                                         # bn2 input
    m, s = bn_stats(pre)
    y = deconv3x3_s2(pre, params["d3_w"], params["d3_b"], "relu", s, m)  # relu(deconv3(bn2))
    m, s = bn_stats(y)                                                   # bn3
    y = deconv3x3_s2(y, params["d4_w"], params["d4_b"], "relu", s, m)    # relu(deconv4(bn3))
    m, s = bn_stats(y)                                                   # bn4
    y = deconv3x3_s2(y, params["d5_w"], params["d5_b"], "relu", s, m)    # relu(deconv5(bn4))
    m, s = bn_stats(y)                                                   # bn5
    prob = conv1x1_sigmoid(y, params["cls_w"], params["cls_b"], s, m)    # sigmoid(cls(bn5))
    return jnp.transpose(prob, (0, 3, 1, 2)).astype(jnp.float32)         # NHWC -> NCHW


# ---------------------------------------------------------------------------
# Pure-JAX (f32, lax.conv) references used only for correctness checks
# ---------------------------------------------------------------------------
def _conv2d_ref(x, w, b):
    """PyTorch Conv2d(k=3, s=1, p=1), NHWC input, w: (Cout, Cin, 3, 3)."""
    w_hwio = jnp.transpose(w, (2, 3, 1, 0))
    y = jax.lax.conv_general_dilated(
        x, w_hwio, window_strides=(1, 1), padding=((1, 1), (1, 1)),
        dimension_numbers=("NHWC", "HWIO", "NHWC"),
        precision=jax.lax.Precision.HIGHEST)
    return y + b.reshape(1, 1, 1, -1)


def _deconv_ref(x, w, b):
    """PyTorch ConvTranspose2d(k=3, s=2, p=1, output_padding=1), NHWC input,
    w: (Cin, Cout, 3, 3)."""
    w_hwio = jnp.transpose(w[:, :, ::-1, ::-1], (2, 3, 0, 1))
    y = jax.lax.conv_general_dilated(
        x, w_hwio, window_strides=(1, 1), padding=((1, 2), (1, 2)),
        lhs_dilation=(2, 2), dimension_numbers=("NHWC", "HWIO", "NHWC"),
        precision=jax.lax.Precision.HIGHEST)
    return y + b.reshape(1, 1, 1, -1)


def fcn8s_reference(params, x_nchw, eps=1e-5):
    x = jnp.transpose(x_nchw, (0, 2, 3, 1)).astype(jnp.float32)
    relu = lambda t: jnp.maximum(t, 0.0)

    def bn(t):
        m = t.mean(axis=(0, 1, 2), keepdims=True)
        v = t.var(axis=(0, 1, 2), keepdims=True)
        return (t - m) * jax.lax.rsqrt(v + eps)

    x = relu(_conv2d_ref(x, params["c0_w"], params["c0_b"])); x = maxpool2(x)
    x = relu(_conv2d_ref(x, params["c1_w"], params["c1_b"])); x = maxpool2(x)
    x = relu(_conv2d_ref(x, params["c2_w"], params["c2_b"]))
    x = relu(_conv2d_ref(x, params["c3_w"], params["c3_b"])); x = maxpool2(x); x3 = x
    x = relu(_conv2d_ref(x, params["c4_w"], params["c4_b"]))
    x = relu(_conv2d_ref(x, params["c5_w"], params["c5_b"])); x = maxpool2(x); x4 = x
    x = relu(_conv2d_ref(x, params["c6_w"], params["c6_b"]))
    x = relu(_conv2d_ref(x, params["c7_w"], params["c7_b"])); x = maxpool2(x); x5 = x

    score = relu(_deconv_ref(x5, params["d1_w"], params["d1_b"]))
    score = bn(score + x4)
    score = relu(_deconv_ref(score, params["d2_w"], params["d2_b"]))
    score = bn(score + x3)
    score = bn(relu(_deconv_ref(score, params["d3_w"], params["d3_b"])))
    score = bn(relu(_deconv_ref(score, params["d4_w"], params["d4_b"])))
    score = bn(relu(_deconv_ref(score, params["d5_w"], params["d5_b"])))
    wcls = params["cls_w"].reshape(params["cls_w"].shape[0], -1)
    logits = jnp.einsum("nhwc,oc->nhwo", score, wcls,
                        precision=jax.lax.Precision.HIGHEST) + params["cls_b"]
    prob = jax.nn.sigmoid(logits)
    return jnp.transpose(prob, (0, 3, 1, 2))


# ---------------------------------------------------------------------------
if __name__ == "__main__":
    n_class = 5
    batch, in_ch, spatial = 2, 3, 32   # VGG11 has 5 max-pools -> spatial >= 32

    key = jax.random.PRNGKey(0)
    key, kx = jax.random.split(key)
    x = jax.random.normal(kx, (batch, in_ch, spatial, spatial), jnp.float32)
    params = init_params(key, n_class)

    # --- single-layer checks against lax convolutions (bf16 MXU tolerance) --
    k1, k2, k3, k4, k5, k6 = jax.random.split(jax.random.PRNGKey(1), 6)

    xc = jax.random.normal(k1, (2, 16, 16, 128), jnp.float32)
    wc = 0.05 * jax.random.normal(k2, (64, 128, 3, 3), jnp.float32)
    bc = 0.05 * jax.random.normal(k3, (64,), jnp.float32)
    got = jax.jit(lambda a, w, b: conv3x3(a, w, b, "relu"))(xc, wc, bc)
    ref = jnp.maximum(_conv2d_ref(xc, wc, bc), 0.0)
    err = float(jnp.max(jnp.abs(got - ref)))
    assert err <= 0.03 * (float(jnp.max(jnp.abs(ref))) + 1e-6), err

    xd = jax.random.normal(k4, (2, 8, 8, 128), jnp.float32)
    wd = 0.05 * jax.random.normal(k5, (128, 64, 3, 3), jnp.float32)
    bd = 0.05 * jax.random.normal(k6, (64,), jnp.float32)
    mu = xd.mean(axis=(0, 1, 2))
    sc = jax.lax.rsqrt(xd.var(axis=(0, 1, 2)) + 1e-5)
    got = jax.jit(lambda a, w, b, s, m: deconv3x3_s2(a, w, b, "relu", s, m))(
        xd, wd, bd, sc, mu)
    ref = jnp.maximum(_deconv_ref((xd - mu) * sc, wd, bd), 0.0)
    err = float(jnp.max(jnp.abs(got - ref)))
    assert err <= 0.03 * (float(jnp.max(jnp.abs(ref))) + 1e-6), err

    # --- full forward pass ---------------------------------------------------
    fwd = jax.jit(fcn8s_forward)
    prob = fwd(params, x)
    jax.block_until_ready(prob)

    assert prob.shape == (batch, n_class, spatial, spatial), prob.shape
    assert bool(jnp.all(jnp.isfinite(prob)))
    assert bool(jnp.all((prob >= 0.0) & (prob <= 1.0)))

    ref_prob = jax.jit(fcn8s_reference)(params, x)
    max_diff = float(jnp.max(jnp.abs(prob - ref_prob)))
    assert max_diff <= 0.06, max_diff

    print("KERNEL_OK")
</pallas_src>

<mosaic_0001>
module attributes {stable_mosaic.version = 11 : i64} {
  func.func @_conv_gemm_kernel(%arg0: i32, %arg1: i32, %arg2: i32, %arg3: memref<1x328x128xf32, #tpu.memory_space<vmem>>, %arg4: memref<3x384x64xbf16, #tpu.memory_space<vmem>>, %arg5: memref<1x64xf32, #tpu.memory_space<vmem>>, %arg6: memref<1x144x64xf32, #tpu.memory_space<vmem>>) attributes {dimension_semantics = [#tpu.dimension_semantics<parallel>, #tpu.dimension_semantics<parallel>, #tpu.dimension_semantics<parallel>], iteration_bounds = array<i64: 2, 1, 2>, scalar_prefetch = 0 : i64, scratch_operands = 0 : i64, tpu.core_type = #tpu.core_type<tc>, window_params = [{transform_indices = @transform_0, window_bounds = array<i64: 1, 328, 128>}, {transform_indices = @transform_1, window_bounds = array<i64: 3, 384, 64>}, {transform_indices = @transform_2, window_bounds = array<i64: 1, 64>}, {transform_indices = @transform_3, window_bounds = array<i64: 1, 144, 64>}]} {
    %c144_i32 = arith.constant 144 : i32
    %0 = arith.muli %arg2, %c144_i32 : i32
    %1 = tpu.assume_multiple %0, 8 : i32
    %c0_i32 = arith.constant 0 : i32
    %2 = arith.addi %1, %c0_i32 : i32
    %c0_i32_0 = arith.constant 0 : i32
    %3 = arith.addi %2, %c0_i32_0 : i32
    %c0 = arith.constant 0 : index
    %4 = arith.index_cast %3 : i32 to index
    %c0_1 = arith.constant 0 : index
    %5 = vector.load %arg3[%c0, %4, %c0_1] : memref<1x328x128xf32, #tpu.memory_space<vmem>>, vector<1x144x128xf32>
    %6 = vector.shape_cast %5 : vector<1x144x128xf32> to vector<144x128xf32>
    %c0_i32_2 = arith.constant 0 : i32
    %7 = arith.addi %1, %c0_i32_2 : i32
    %c1_i32 = arith.constant 1 : i32
    %8 = arith.addi %7, %c1_i32 : i32
    %c0_3 = arith.constant 0 : index
    %9 = arith.index_cast %8 : i32 to index
    %c0_4 = arith.constant 0 : index
    %10 = vector.load %arg3[%c0_3, %9, %c0_4] : memref<1x328x128xf32, #tpu.memory_space<vmem>>, vector<1x144x128xf32>
    %11 = vector.shape_cast %10 : vector<1x144x128xf32> to vector<144x128xf32>
    %c0_i32_5 = arith.constant 0 : i32
    %12 = arith.addi %1, %c0_i32_5 : i32
    %c2_i32 = arith.constant 2 : i32
    %13 = arith.addi %12, %c2_i32 : i32
    %c0_6 = arith.constant 0 : index
    %14 = arith.index_cast %13 : i32 to index
    %c0_7 = arith.constant 0 : index
    %15 = vector.load %arg3[%c0_6, %14, %c0_7] : memref<1x328x128xf32, #tpu.memory_space<vmem>>, vector<1x144x128xf32>
    %16 = vector.shape_cast %15 : vector<1x144x128xf32> to vector<144x128xf32>
    %17 = tpu.concatenate %6, %11, %16 in 1 : vector<144x128xf32>, vector<144x128xf32>, vector<144x128xf32> -> vector<144x384xf32>
    %18 = arith.truncf %17 : vector<144x384xf32> to vector<144x384xbf16>
    %c0_8 = arith.constant 0 : index
    %c0_9 = arith.constant 0 : index
    %c0_10 = arith.constant 0 : index
    %19 = vector.load %arg4[%c0_8, %c0_9, %c0_10] : memref<3x384x64xbf16, #tpu.memory_space<vmem>>, vector<1x384x64xbf16>
    %20 = vector.shape_cast %19 : vector<1x384x64xbf16> to vector<384x64xbf16>
    %cst = arith.constant dense<0.000000e+00> : vector<144x64xf32>
    %21 = tpu.matmul %18, %20, %cst {dimension_numbers = #tpu.dot_dimension_numbers<[1], [0], [0], [1], [0, 0, 1, 1], [], []>} : vector<144x384xbf16>, vector<384x64xbf16>, vector<144x64xf32> -> vector<144x64xf32>
    %c18_i32 = arith.constant 18 : i32
    %22 = arith.addi %1, %c18_i32 : i32
    %c0_i32_11 = arith.constant 0 : i32
    %23 = arith.addi %22, %c0_i32_11 : i32
    %c0_12 = arith.constant 0 : index
    %24 = arith.index_cast %23 : i32 to index
    %c0_13 = arith.constant 0 : index
    %25 = vector.load %arg3[%c0_12, %24, %c0_13] : memref<1x328x128xf32, #tpu.memory_space<vmem>>, vector<1x144x128xf32>
    %26 = vector.shape_cast %25 : vector<1x144x128xf32> to vector<144x128xf32>
    %c18_i32_14 = arith.constant 18 : i32
    %27 = arith.addi %1, %c18_i32_14 : i32
    %c1_i32_15 = arith.constant 1 : i32
    %28 = arith.addi %27, %c1_i32_15 : i32
    %c0_16 = arith.constant 0 : index
    %29 = arith.index_cast %28 : i32 to index
    %c0_17 = arith.constant 0 : index
    %30 = vector.load %arg3[%c0_16, %29, %c0_17] : memref<1x328x128xf32, #tpu.memory_space<vmem>>, vector<1x144x128xf32>
    %31 = vector.shape_cast %30 : vector<1x144x128xf32> to vector<144x128xf32>
    %c18_i32_18 = arith.constant 18 : i32
    %32 = arith.addi %1, %c18_i32_18 : i32
    %c2_i32_19 = arith.constant 2 : i32
    %33 = arith.addi %32, %c2_i32_19 : i32
    %c0_20 = arith.constant 0 : index
    %34 = arith.index_cast %33 : i32 to index
    %c0_21 = arith.constant 0 : index
    %35 = vector.load %arg3[%c0_20, %34, %c0_21] : memref<1x328x128xf32, #tpu.memory_space<vmem>>, vector<1x144x128xf32>
    %36 = vector.shape_cast %35 : vector<1x144x128xf32> to vector<144x128xf32>
    %37 = tpu.concatenate %26, %31, %36 in 1 : vector<144x128xf32>, vector<144x128xf32>, vector<144x128xf32> -> vector<144x384xf32>
    %38 = arith.truncf %37 : vector<144x384xf32> to vector<144x384xbf16>
    %c1 = arith.constant 1 : index
    %c0_22 = arith.constant 0 : index
    %c0_23 = arith.constant 0 : index
    %39 = vector.load %arg4[%c1, %c0_22, %c0_23] : memref<3x384x64xbf16, #tpu.memory_space<vmem>>, vector<1x384x64xbf16>
    %40 = vector.shape_cast %39 : vector<1x384x64xbf16> to vector<384x64xbf16>
    %cst_24 = arith.constant dense<0.000000e+00> : vector<144x64xf32>
    %41 = tpu.matmul %38, %40, %cst_24 {dimension_numbers = #tpu.dot_dimension_numbers<[1], [0], [0], [1], [0, 0, 1, 1], [], []>} : vector<144x384xbf16>, vector<384x64xbf16>, vector<144x64xf32> -> vector<144x64xf32>
    %42 = arith.addf %21, %41 : vector<144x64xf32>
    %c36_i32 = arith.constant 36 : i32
    %43 = arith.addi %1, %c36_i32 : i32
    %c0_i32_25 = arith.constant 0 : i32
    %44 = arith.addi %43, %c0_i32_25 : i32
    %c0_26 = arith.constant 0 : index
    %45 = arith.index_cast %44 : i32 to index
    %c0_27 = arith.constant 0 : index
    %46 = vector.load %arg3[%c0_26, %45, %c0_27] : memref<1x328x128xf32, #tpu.memory_space<vmem>>, vector<1x144x128xf32>
    %47 = vector.shape_cast %46 : vector<1x144x128xf32> to vector<144x128xf32>
    %c36_i32_28 = arith.constant 36 : i32
    %48 = arith.addi %1, %c36_i32_28 : i32
    %c1_i32_29 = arith.constant 1 : i32
    %49 = arith.addi %48, %c1_i32_29 : i32
    %c0_30 = arith.constant 0 : index
    %50 = arith.index_cast %49 : i32 to index
    %c0_31 = arith.constant 0 : index
    %51 = vector.load %arg3[%c0_30, %50, %c0_31] : memref<1x328x128xf32, #tpu.memory_space<vmem>>, vector<1x144x128xf32>
    %52 = vector.shape_cast %51 : vector<1x144x128xf32> to vector<144x128xf32>
    %c36_i32_32 = arith.constant 36 : i32
    %53 = arith.addi %1, %c36_i32_32 : i32
    %c2_i32_33 = arith.constant 2 : i32
    %54 = arith.addi %53, %c2_i32_33 : i32
    %c0_34 = arith.constant 0 : index
    %55 = arith.index_cast %54 : i32 to index
    %c0_35 = arith.constant 0 : index
    %56 = vector.load %arg3[%c0_34, %55, %c0_35] : memref<1x328x128xf32, #tpu.memory_space<vmem>>, vector<1x144x128xf32>
    %57 = vector.shape_cast %56 : vector<1x144x128xf32> to vector<144x128xf32>
    %58 = tpu.concatenate %47, %52, %57 in 1 : vector<144x128xf32>, vector<144x128xf32>, vector<144x128xf32> -> vector<144x384xf32>
    %59 = arith.truncf %58 : vector<144x384xf32> to vector<144x384xbf16>
    %c2 = arith.constant 2 : index
    %c0_36 = arith.constant 0 : index
    %c0_37 = arith.constant 0 : index
    %60 = vector.load %arg4[%c2, %c0_36, %c0_37] : memref<3x384x64xbf16, #tpu.memory_space<vmem>>, vector<1x384x64xbf16>
    %61 = vector.shape_cast %60 : vector<1x384x64xbf16> to vector<384x64xbf16>
    %cst_38 = arith.constant dense<0.000000e+00> : vector<144x64xf32>
    %62 = tpu.matmul %59, %61, %cst_38 {dimension_numbers = #tpu.dot_dimension_numbers<[1], [0], [0], [1], [0, 0, 1, 1], [], []>} : vector<144x384xbf16>, vector<384x64xbf16>, vector<144x64xf32> -> vector<144x64xf32>
    %63 = arith.addf %42, %62 : vector<144x64xf32>
    %c0_39 = arith.constant 0 : index
    %c0_40 = arith.constant 0 : index
    %64 = vector.load %arg5[%c0_39, %c0_40] : memref<1x64xf32, #tpu.memory_space<vmem>>, vector<1x64xf32>
    %65 = vector.broadcast %64 : vector<1x64xf32> to vector<144x64xf32>
    %66 = arith.addf %63, %65 : vector<144x64xf32>
    %cst_41 = arith.constant 0.000000e+00 : f32
    %67 = vector.broadcast %cst_41 : f32 to vector<144x64xf32>
    %68 = arith.maximumf %66, %67 : vector<144x64xf32>
    %c0_42 = arith.constant 0 : index
    %c0_43 = arith.constant 0 : index
    %c0_44 = arith.constant 0 : index
    %69 = vector.load %arg6[%c0_42, %c0_43, %c0_44] : memref<1x144x64xf32, #tpu.memory_space<vmem>>, vector<1x144x64xf32>
    %70 = vector.shape_cast %69 : vector<1x144x64xf32> to vector<144x64xf32>
    %71 = vector.shape_cast %68 : vector<144x64xf32> to vector<1x144x64xf32>
    tpu.vector_store %arg6[%c0_42, %c0_43, %c0_44], %71 {strides = array<i32>} : memref<1x144x64xf32, #tpu.memory_space<vmem>>, vector<1x144x64xf32>,
    return
  }
  func.func @transform_0(%arg0: i32, %arg1: i32, %arg2: i32) -> (i32, i32, i32) {
    %c0_i32 = arith.constant 0 : i32
    %c0_i32_0 = arith.constant 0 : i32
    %c0_i32_1 = arith.constant 0 : i32
    return %arg0, %c0_i32, %c0_i32_0 : i32, i32, i32
  }
  func.func @transform_1(%arg0: i32, %arg1: i32, %arg2: i32) -> (i32, i32, i32) {
    %c0_i32 = arith.constant 0 : i32
    %c0_i32_0 = arith.constant 0 : i32
    %c0_i32_1 = arith.constant 0 : i32
    return %c0_i32, %c0_i32_0, %arg1 : i32, i32, i32
  }
  func.func @transform_2(%arg0: i32, %arg1: i32, %arg2: i32) -> (i32, i32) {
    %c0_i32 = arith.constant 0 : i32
    %c0_i32_0 = arith.constant 0 : i32
    return %c0_i32, %arg1 : i32, i32
  }
  func.func @transform_3(%arg0: i32, %arg1: i32, %arg2: i32) -> (i32, i32, i32) {
    %c0_i32 = arith.constant 0 : i32
    return %arg0, %arg2, %arg1 : i32, i32, i32
  }
}

</mosaic_0001>

<bundles_post_ra>
// kernel: _lambda_.1
= control target key start
LH: loop header
LB: loop body
LE: loop exit
PB: predicated region body
PF: predicated region fallthrough
CT: control target
= control target key end

     0   :  { %s2859_s12 = smov 0   ;;  %s2861_s13 = smov 0   ;;  %s3581_s0 = inlined_call_operand.vmem [shape: f32[2,328,128], index: 0, kind: input, shape index: {}]   ;;  %s3582_s1 = inlined_call_operand.vmem [shape: bf16[3,384,64], index: 1, kind: input, shape index: {}]   ;;  %s3583_s2 = inlined_call_operand.vmem [shape: f32[1,64], index: 2, kind: input, shape index: {}]   ;;  %s3584_s3 = inlined_call_operand.vmem [shape: f32[2,288,64], index: 3, kind: output, shape index: {}]  }
   0x1   :  { %s2863_s14 = smov 0   ;;  %s2865_s15 = smov 0  }
   0x2   :  { %s2867_s16 = smov 0  }
   0x3 LB: > { %s25_s17 = sadd.s32 1, %s2827_s14  ;;  %s32_s18 = sadd.s32 1, %s2831_s15  ;;  %s2835_s16 = sphi %s2867_s16, %s13_s16   ;;  %s2831_s15 = sphi %s2865_s15, %s3588_s15   ;;  %s2827_s14 = sphi %s2863_s14, %s3587_s14   ;;  %s2823_s13 = sphi %s2861_s13, %s3586_s13   ;;  %s2819_s12 = sphi %s2859_s12, %s3585_s12  }
   0x4   : > { %p26_p0 = scmp.ge.s32.totalorder %s25_s17, 2  ;;  %p1946_p1 = scmp.ge.s32.totalorder %s2835_s16, 1 }
   0x5   : > { %p177_p2 = scmp.lt.s32.totalorder %s2835_s16, 5 }
   0x6   : > { %s3590_s17 = smov (%p26_p0, %s25_s17), 0  ;;  %s3592_s18 = smov (!%p26_p0, %s32_s18), %s2831_s15 }
   0x7   : > { %p178_p3 = pnand %p1946_p1, %p177_p2  ;;  %p34_p4 = scmp.ge.s32.totalorder %s3592_s18, 2 }
   0x8   : > { %p215_p5 = scmp.lt.s32.totalorder (!%p178_p3), %s2823_s13, 1  ;;  %s241_s5 = smul.u32 (!%p178_p3), 144, %s2819_s12 }
   0x9   : > { %s3594_s18 = smov (%p34_p4, %s3592_s18), 0  ;;  %181 = sbr.rel (%p178_p3) target bundleno = 466 (0x1d2), region = 32 }
   0xe   : > { %v2725_v0 = vld [vmem:[%s3582_s1 + $0x138] sm:$0xff]   ;;  %v2837_v1 = vmov 0.0   ;;  %vm2838_vm0 = vmmov 0   ;;  %v2728_v4 = vld [vmem:[%s3582_s1 + $0x130] sm:$0xff]   ;;  %v2731_v7 = vld [vmem:[%s3582_s1 + $0x128] sm:$0xff]   ;;  %s3596_s13 = smov (!%p215_p5, %s2823_s13), 1 }
   0xf   : > { %2525 = vmatprep.subr.bf16.mxu1 %v2837_v1  ;;  %v2726_v2 = vld [vmem:[%s3582_s1 + $0x178] sm:$0xff]   ;;  %2264 = vmatprep.subr.bf16.mxu0 %v2725_v0  ;;  %v2729_v5 = vld [vmem:[%s3582_s1 + $0x170] sm:$0xff]   ;;  %v2732_v8 = vld [vmem:[%s3582_s1 + $0x168] sm:$0xff]   ;;  %s2681_s25 = smul.u32 328, %s3596_s13  ;;  %vm1771_vm1 = vcmask 523264  }
  0x10   : > { %v2727_v3 = vld [vmem:[%s3582_s1 + $0xf8] sm:$0xff]   ;;  %2541 = vmatprep.mubr.msk.bf16.mxu1 %vm2838_vm0, %v2837_v1  ;;  %2526 = vmatpush3.bf16.msra.mxu1 %v2726_v2  ;;  %v2730_v6 = vld [vmem:[%s3582_s1 + $0xf0] sm:$0xff]   ;;  %v2733_v9 = vld [vmem:[%s3582_s1 + $0xe8] sm:$0xff]   ;;  %s2682_s7 = smul.u32 36, %s3596_s13 }
  0x11   : > { %2265 = vmatpush3.bf16.msra.mxu0 %v2727_v3  ;;  %2527 = vmatprep.subr.bf16.mxu1 %v2837_v1  ;;  %v2734_v10 = vld [vmem:[%s3582_s1 + $0x120] sm:$0xff]   ;;  %v2737_v13 = vld [vmem:[%s3582_s1 + $0x118] sm:$0xff]   ;;  %v2740_v16 = vld [vmem:[%s3582_s1 + $0x110] sm:$0xff]   ;;  %s219_s8 = scalar_lea.vmem %s3581_s0, %s2681_s25 }
  0x12   : > { %2266 = vmatprep.subr.bf16.mxu0 %v2728_v4  ;;  %v2735_v11 = vld [vmem:[%s3582_s1 + $0x160] sm:$0xff]   ;;  %v2738_v14 = vld [vmem:[%s3582_s1 + $0x158] sm:$0xff]   ;;  %v2741_v17 = vld [vmem:[%s3582_s1 + $0x150] sm:$0xff]   ;;  %s2967_s22 = scalar_lea.vmem %s219_s8, %s241_s5 }
  0x13   : > { %v2736_v12 = vld [vmem:[%s3582_s1 + $0xe0] sm:$0xff]   ;;  %v2739_v15 = vld [vmem:[%s3582_s1 + $0xd8] sm:$0xff]   ;;  %v2742_v18 = vld [vmem:[%s3582_s1 + $0xd0] sm:$0xff]  }
  0x14   : > { %2528 = vmatpush3.bf16.msra.mxu1 %v2729_v5  ;;  %v2743_v19 = vld [vmem:[%s3582_s1 + $0x108] sm:$0xff]   ;;  %v2003_v22 = vld [vmem:[%s2967_s22 + $0x13] sm:$0xff]  ;;  %v2004_v23 = vld [vmem:[%s2967_s22 + $0x1b] sm:$0xff] }
  0x15   : > { %2267 = vmatpush3.bf16.msra.mxu0 %v2730_v6  ;;  %2529 = vmatprep.subr.bf16.mxu1 %v2837_v1  ;;  %v2744_v20 = vld [vmem:[%s3582_s1 + $0x148] sm:$0xff]   ;;  %v2746_v24 = vld [vmem:[%s3582_s1 + $0x100] sm:$0xff]   ;;  %v437_v26 = vpack.c.bf16 %v2004_v23, %v2003_v22  ;;  %v2021_v27 = vld [vmem:[%s2967_s22 + $0x14] sm:$0xff] }
  0x16   : > { %2268 = vmatprep.subr.bf16.mxu0 %v2731_v7  ;;  %v2745_v21 = vld [vmem:[%s3582_s1 + $0xc8] sm:$0xff]   ;;  %v2747_v25 = vld [vmem:[%s3582_s1 + $0x140] sm:$0xff]   ;;  %v1985_v30 = vld [vmem:[%s2967_s22 + $0x12] sm:$0xff] }
  0x17   : > { %v2748_v28 = vld [vmem:[%s3582_s1 + $0xc0] sm:$0xff]   ;;  %688 = vmatprep.mubr.bf16.mxu0 %v437_v26  ;;  %v2749_v32 = vld [vmem:[%s3582_s1 + $0x78] sm:$0xff]   ;;  %v2006_v35 = vld [vmem:[%s2967_s22 + $0x2b] sm:$0xff] }
  0x18   : > { %2530 = vmatpush3.bf16.msra.mxu1 %v2732_v8  ;;  %v2022_v29 = vld [vmem:[%s2967_s22 + $0x1c] sm:$0xff]  ;;  %v2023_v40 = vld [vmem:[%s2967_s22 + $0x24] sm:$0xff]  ;;  %v2752_v41 = vld [vmem:[%s3582_s1 + $0x70] sm:$0xff]  }
  0x19   : > { %2269 = vmatpush3.bf16.msra.mxu0 %v2733_v9  ;;  %2531 = vmatprep.subr.bf16.mxu1 %v2837_v1  ;;  %v1986_v31 = vld [vmem:[%s2967_s22 + $0x1a] sm:$0xff]  ;;  %v438_v33 = vpack.c.bf16 %v2022_v29, %v2021_v27  ;;  %v2005_v34 = vld [vmem:[%s2967_s22 + $0x23] sm:$0xff]  ;;  %v2024_v42 = vld [vmem:[%s2967_s22 + $0x2c] sm:$0xff] }
  0x1a   : > { %2270 = vmatprep.subr.bf16.mxu0 %v2734_v10  ;;  %v2997_v36 = vpack.c.bf16 %v1986_v31, %v1985_v30  ;;  %v2751_v37 = vld [vmem:[%s3582_s1 + $0xb8] sm:$0xff]   ;;  %v440_v39 = vpack.c.bf16 %v2006_v35, %v2005_v34  ;;  %v1987_v43 = vld [vmem:[%s2967_s22 + $0x22] sm:$0xff]  ;;  %v1988_v44 = vld [vmem:[%s2967_s22 + $0x2a] sm:$0xff]  ;;  %v3027_v50 = vpack.c.bf16 %v2024_v42, %v2023_v40 }
  0x1b   : > { %v2750_v38 = vld [vmem:[%s3582_s1 + $0x38] sm:$0xff]   ;;  %v2753_v45 = vld [vmem:[%s3582_s1 + $0x30] sm:$0xff]   ;;  %v2755_v49 = vld [vmem:[%s3582_s1 + $0x68] sm:$0xff]   ;;  %v3030_v51 = vpack.c.bf16 %v1988_v44, %v1987_v43 }
  0x1c   : > { %2532 = vmatpush3.bf16.msra.mxu1 %v2735_v11  ;;  %v2754_v46 = vld [vmem:[%s3582_s1 + $0xb0] sm:$0xff]   ;;  %v2008_v48 = vld [vmem:[%s2967_s22 + $0x3b] sm:$0xff]  ;;  %v2756_v53 = vld [vmem:[%s3582_s1 + $0x28] sm:$0xff]  }
  0x1d   : > { %2271 = vmatpush3.bf16.msra.mxu0 %v2736_v12  ;;  %2533 = vmatprep.subr.bf16.mxu1 %v2837_v1  ;;  %v2007_v47 = vld [vmem:[%s2967_s22 + $0x33] sm:$0xff]  ;;  %v2757_v54 = vld [vmem:[%s3582_s1 + $0xa8] sm:$0xff]   ;;  %v2758_v55 = vld [vmem:[%s3582_s1 + $0x60] sm:$0xff]  }
  0x1e   : > { %2272 = vmatprep.subr.bf16.mxu0 %v2737_v13  ;;  %v443_v52 = vpack.c.bf16 %v2008_v48, %v2007_v47  ;;  %v2025_v56 = vld [vmem:[%s2967_s22 + $0x34] sm:$0xff]  ;;  %v2026_v57 = vld [vmem:[%s2967_s22 + $0x3c] sm:$0xff]  ;;  %v2010_v61 = vld [vmem:[%s2967_s22 + $0x4b] sm:$0xff] }
  0x1f   : > { %v1989_v58 = vld [vmem:[%s2967_s22 + $0x32] sm:$0xff]  ;;  %v1990_v59 = vld [vmem:[%s2967_s22 + $0x3a] sm:$0xff]  ;;  %v2009_v60 = vld [vmem:[%s2967_s22 + $0x43] sm:$0xff]  ;;  %v3058_v0 = vpack.c.bf16 %v2026_v57, %v2025_v56 }
  0x20   : > { %2534 = vmatpush3.bf16.msra.mxu1 %v2738_v14  ;;  %v2759_v62 = vld [vmem:[%s3582_s1 + $0x20] sm:$0xff]   ;;  %v2761_v2 = vld [vmem:[%s3582_s1 + $0x58] sm:$0xff]   ;;  %v3064_v3 = vpack.c.bf16 %v1990_v59, %v1989_v58  ;;  %v446_v4 = vpack.c.bf16 %v2010_v61, %v2009_v60  ;;  %v2028_v7 = vld [vmem:[%s2967_s22 + $0x4c] sm:$0xff] }
  0x21   : > { %2273 = vmatpush3.bf16.msra.mxu0 %v2739_v15  ;;  %2535 = vmatprep.subr.bf16.mxu1 %v2837_v1  ;;  %v2760_v63 = vld [vmem:[%s3582_s1 + $0xa0] sm:$0xff]   ;;  %v2762_v5 = vld [vmem:[%s3582_s1 + $0x18] sm:$0xff]   ;;  %v1992_v9 = vld [vmem:[%s2967_s22 + $0x4a] sm:$0xff] }
  0x22   : > { %2274 = vmatprep.subr.bf16.mxu0 %v2740_v16  ;;  %v2027_v6 = vld [vmem:[%s2967_s22 + $0x44] sm:$0xff]  ;;  %v2763_v10 = vld [vmem:[%s3582_s1 + $0x98] sm:$0xff]   ;;  %v2764_v11 = vld [vmem:[%s3582_s1 + $0x50] sm:$0xff]  }
  0x23   : > { %v1991_v8 = vld [vmem:[%s2967_s22 + $0x42] sm:$0xff]  ;;  %v2765_v12 = vld [vmem:[%s3582_s1 + $0x10] sm:$0xff]   ;;  %v3089_v15 = vpack.c.bf16 %v2028_v7, %v2027_v6  ;;  %v1994_v23 = vld [vmem:[%s2967_s22 + $0x5a] sm:$0xff] }
  0x24   : > { %2536 = vmatpush3.bf16.msra.mxu1 %v2741_v17  ;;  %v2011_v13 = vld [vmem:[%s2967_s22 + $0x53] sm:$0xff]  ;;  %v2012_v14 = vld [vmem:[%s2967_s22 + $0x5b] sm:$0xff]  ;;  %v3092_v16 = vpack.c.bf16 %v1992_v9, %v1991_v8  ;;  %v2013_v26 = vld [vmem:[%s2967_s22 + $0x63] sm:$0xff] }
  0x25   : > { %2275 = vmatpush3.bf16.msra.mxu0 %v2742_v18  ;;  %2537 = vmatprep.subr.bf16.mxu1 %v2837_v1  ;;  %v2766_v17 = vld [vmem:[%s3582_s1 + $0x90] sm:$0xff]   ;;  %v449_v18 = vpack.c.bf16 %v2012_v14, %v2011_v13  ;;  %v2770_v30 = vld [vmem:[%s3582_s1 + $0x40] sm:$0xff]   ;;  %v2773_v40 = vld [vmem:[%s3582_s1 + $0x1f8] sm:$0xff]  }
  0x26   : > { %2276 = vmatprep.subr.bf16.mxu0 %v2743_v19  ;;  %v2767_v19 = vld [vmem:[%s3582_s1 + $0x48] sm:$0xff]   ;;  %v1993_v22 = vld [vmem:[%s2967_s22 + $0x52] sm:$0xff]  ;;  %v1998_v48 = vld [vmem:[%s2967_s22 + $0x7a] sm:$0xff] }
  0x27   : > { %v2014_v27 = vld [vmem:[%s2967_s22 + $0x6b] sm:$0xff]  ;;  %v3119_v29 = vpack.c.bf16 %v1994_v23, %v1993_v22  ;;  %v1999_v58 = vld [vmem:[%s2967_s22 + $0x82] sm:$0xff]  ;;  %v2019_v60 = vld [vmem:[%s2967_s22 + $0x93] sm:$0xff] }
  0x28   : > { %2538 = vmatpush3.bf16.msra.mxu1 %v2744_v20  ;;  %v2029_v20 = vld [vmem:[%s2967_s22 + $0x54] sm:$0xff]  ;;  %v452_v31 = vpack.c.bf16 %v2014_v27, %v2013_v26  ;;  %v2031_v34 = vld [vmem:[%s2967_s22 + $0x64] sm:$0xff]  ;;  %v2032_v35 = vld [vmem:[%s2967_s22 + $0x6c] sm:$0xff] }
  0x29   : > { %2277 = vmatpush3.bf16.msra.mxu0 %v2745_v21  ;;  %2539 = vmatprep.subr.bf16.mxu1 %v2837_v1  ;;  %v2030_v21 = vld [vmem:[%s2967_s22 + $0x5c] sm:$0xff]  ;;  %v3145_v42 = vpack.c.bf16 %v2032_v35, %v2031_v34  ;;  %v1997_v47 = vld [vmem:[%s2967_s22 + $0x72] sm:$0xff]  ;;  %v2035_v56 = vld [vmem:[%s2967_s22 + $0x84] sm:$0xff] }
  0x2a   : > { %2278 = vmatprep.subr.bf16.mxu0 %v2746_v24  ;;  %v2768_v24 = vld [vmem:[%s3582_s1 + $0x8] sm:$0xff]   ;;  %v2020_v61 = vld [vmem:[%s2967_s22 + $0x9b] sm:$0xff]  ;;  %v2001_v6 = vld [vmem:[%s2967_s22 + $0x92] sm:$0xff] }
  0x2b   : > { %v2036_v57 = vld [vmem:[%s2967_s22 + $0x8c] sm:$0xff]  ;;  %v2002_v7 = vld [vmem:[%s2967_s22 + $0x9a] sm:$0xff]  ;;  %v1967_v13 = vld [vmem:[%s2967_s22 + $0x2] sm:$0xff] }
  0x2c   : > { %2540 = vmatpush3.bf16.msra.mxu1 %v2747_v25  ;;  %v2769_v25 = vld [vmem:[%s3582_s1 + $0x88] sm:$0xff]   ;;  %v2775_v23 = vld [vmem:[%s3582_s1 + $0x238] sm:$0xff]   ;;  %v2776_v26 = vld [vmem:[%s3582_s1 + $0x1f0] sm:$0xff]  }
  0x2d   : > { %2279 = vmatpush3.bf16.msra.mxu0 %v2748_v28  ;;  %2577 = vmatprep.subr.bf16.mxu1 %v2837_v1  ;;  %v3117_v28 = vpack.c.bf16 %v2030_v21, %v2029_v20  ;;  %v2000_v59 = vld [vmem:[%s2967_s22 + $0x8a] sm:$0xff]  ;;  %v1949_v8 = vld [vmem:[%s2967_s22 + $0x1] sm:$0xff]  ;;  %v1952_v21 = vld [vmem:[%s2967_s22 + $0x19] sm:$0xff] }
  0x2e   : > { %2351 = vmatprep.subr.bf16.mxu0 %v2749_v32  ;;  %v2771_v32 = vld [vmem:[%s3582_s1] sm:$0xff]   ;;  %v1950_v9 = vld [vmem:[%s2967_s22 + $0x9] sm:$0xff]  ;;  %v1951_v20 = vld [vmem:[%s2967_s22 + $0x11] sm:$0xff] }
  0x2f   : > { %2542 = vmatmul.mubr.bf16.vlgmr.msra.gmra.mxu1 %v438_v33  ;;  %v2772_v33 = vld [vmem:[%s3582_s1 + $0x80] sm:$0xff]   ;;  %v1968_v14 = vld [vmem:[%s2967_s22 + $0xa] sm:$0xff] }
  0x30   : > { %689 = vmatmul.mubr.bf16.vlgmr.msra.gmra.mxu0 %v2997_v36  ;;  %2578 = vmatpush3.bf16.msra.mxu1 %v2751_v37  ;;  %v1995_v37 = vld [vmem:[%s2967_s22 + $0x62] sm:$0xff]  ;;  %v2778_v27 = vld [vmem:[%s3582_s1 + $0x230] sm:$0xff]  }
  0x31   : > { %2352 = vmatpush3.bf16.msra.mxu0 %v2750_v38  ;;  %2545 = vmatprep.mubr.msk.bf16.mxu1 %vm2838_vm0, %v2837_v1  ;;  %v1996_v38 = vld [vmem:[%s2967_s22 + $0x6a] sm:$0xff] }
  0x32   : > { %696 = vmatprep.mubr.bf16.mxu0 %v440_v39  ;;  %2353 = vmatprep.subr.bf16.mxu0 %v2752_v41  ;;  %v2015_v39 = vld [vmem:[%s2967_s22 + $0x73] sm:$0xff]  ;;  %v2016_v41 = vld [vmem:[%s2967_s22 + $0x7b] sm:$0xff]  ;;  %v3147_v43 = vpack.c.bf16 %v1996_v38, %v1995_v37  ;;  %v1954_v34 = vld [vmem:[%s2967_s22 + $0x29] sm:$0xff] }
  0x33   : > { %2579 = vmatprep.subr.bf16.mxu1 %v2837_v1  ;;  %v455_v44 = vpack.c.bf16 %v2016_v41, %v2015_v39  ;;  %v2779_v35 = vld [vmem:[%s3582_s1 + $0x1e8] sm:$0xff]   ;;  %v2782_v41 = vld [vmem:[%s3582_s1 + $0x1e0] sm:$0xff]  }
  0x34   : > { %2580 = vmatpush3.bf16.msra.mxu1 %v2754_v46  ;;  %v2034_v46 = vld [vmem:[%s2967_s22 + $0x7c] sm:$0xff]  ;;  %v2780_v39 = vld [vmem:[%s3582_s1 + $0x1a8] sm:$0xff]  }
  0x35   : > { %2354 = vmatpush3.bf16.msra.mxu0 %v2753_v45  ;;  %2581 = vmatprep.subr.bf16.mxu1 %v2837_v1  ;;  %v2033_v45 = vld [vmem:[%s2967_s22 + $0x74] sm:$0xff] }
  0x36   : > { %2355 = vmatprep.subr.bf16.mxu0 %v2755_v49  ;;  %v2017_v49 = vld [vmem:[%s2967_s22 + $0x83] sm:$0xff] }
  0x37   : > { %2546 = vmatmul.mubr.bf16.gmra.mxu1 %v3027_v50 }
  0x38   : > { %697 = vmatmul.mubr.bf16.gmra.mxu0 %v3030_v51  ;;  %2549 = vmatprep.mubr.msk.bf16.mxu1 %vm2838_vm0, %v2837_v1 }
  0x39   : > { %704 = vmatprep.mubr.bf16.mxu0 %v443_v52  ;;  %2356 = vmatpush3.bf16.msra.mxu0 %v2756_v53  ;;  %v2018_v52 = vld [vmem:[%s2967_s22 + $0x8b] sm:$0xff]  ;;  %v3159_v53 = vpack.c.bf16 %v2034_v46, %v2033_v45 }
  0x3a   : > { %2582 = vmatpush3.bf16.msra.mxu1 %v2757_v54  ;;  %2357 = vmatprep.subr.bf16.mxu0 %v2758_v55  ;;  %v3161_v54 = vpack.c.bf16 %v1998_v48, %v1997_v47  ;;  %v458_v55 = vpack.c.bf16 %v2018_v52, %v2017_v49  ;;  %v248_v45 = vld [vmem:[%s2967_s22 + $0x28] sm:$0xff]  ;;  %v1955_v46 = vld [vmem:[%s2967_s22 + $0x31] sm:$0xff]  ;;  %v2783_v47 = vld [vmem:[%s3582_s1 + $0x1a0] sm:$0xff]  }
  0x3b   : > { %2583 = vmatprep.subr.bf16.mxu1 %v2837_v1  ;;  %v1956_v48 = vld [vmem:[%s2967_s22 + $0x39] sm:$0xff] }
  0x3c   : > { %v2785_v49 = vld [vmem:[%s3582_s1 + $0x1d8] sm:$0xff]  }
  0x3d   : > { %2358 = vmatpush3.bf16.msra.mxu0 %v2759_v62  ;;  %v3173_v62 = vpack.c.bf16 %v2036_v57, %v2035_v56  ;;  %v2786_v56 = vld [vmem:[%s3582_s1 + $0x198] sm:$0xff]  }
  0x3e   : > { %2584 = vmatpush3.bf16.msra.mxu1 %v2760_v63  ;;  %2359 = vmatprep.subr.bf16.mxu0 %v2761_v2  ;;  %v3175_v63 = vpack.c.bf16 %v2000_v59, %v1999_v58  ;;  %v461_v2 = vpack.c.bf16 %v2020_v61, %v2019_v60  ;;  %v2787_v57 = vld [vmem:[%s3582_s1 + $0x218] sm:$0xff]   ;;  %v2788_v58 = vld [vmem:[%s3582_s1 + $0x1d0] sm:$0xff]   ;;  %v1957_v61 = vld [vmem:[%s2967_s22 + $0x41] sm:$0xff] }
  0x3f   : > { %2550 = vmatmul.mubr.bf16.gmra.mxu1 %v3058_v0  ;;  %2585 = vmatprep.subr.bf16.mxu1 %v2837_v1  ;;  %v249_v59 = vld [vmem:[%s2967_s22 + $0x30] sm:$0xff]  ;;  %v250_v60 = vld [vmem:[%s2967_s22 + $0x38] sm:$0xff] }
  0x40   : > { %705 = vmatmul.mubr.bf16.gmra.mxu0 %v3064_v3  ;;  %2553 = vmatprep.mubr.msk.bf16.mxu1 %vm2838_vm0, %v2837_v1 }
  0x41   : > { %712 = vmatprep.mubr.bf16.mxu0 %v446_v4  ;;  %2360 = vmatpush3.bf16.msra.mxu0 %v2762_v5  ;;  %v2037_v4 = vld [vmem:[%s2967_s22 + $0x94] sm:$0xff]  ;;  %v2038_v5 = vld [vmem:[%s2967_s22 + $0x9c] sm:$0xff] }
  0x42   : > { %2586 = vmatpush3.bf16.msra.mxu1 %v2763_v10  ;;  %2361 = vmatprep.subr.bf16.mxu0 %v2764_v11  ;;  %v3187_v10 = vpack.c.bf16 %v2038_v5, %v2037_v4  ;;  %v460_v11 = vpack.c.bf16 %v2002_v7, %v2001_v6  ;;  %v1958_v4 = vld [vmem:[%s2967_s22 + $0x49] sm:$0xff]  ;;  %v310_v6 = vpack.c.bf16 %v250_v60, %v249_v59 }
  0x43   : > { %2587 = vmatprep.subr.bf16.mxu1 %v2837_v1  ;;  %v2791_v5 = vld [vmem:[%s3582_s1 + $0x1c8] sm:$0xff]   ;;  %v314_v7 = vpack.c.bf16 %v1958_v4, %v1957_v61  ;;  %v2159_v61 = vld [vmem:[%s2967_s22 + $0x55] sm:$0xff] }
  0x44   : > { %v2176_v60 = vld [vmem:[%s2967_s22 + $0x4e] sm:$0xff] }
  0x45   : > { %2362 = vmatpush3.bf16.msra.mxu0 %v2765_v12  ;;  %v302_v12 = vpack.c.bf16 %v1950_v9, %v1949_v8  ;;  %v2792_v8 = vld [vmem:[%s3582_s1 + $0x188] sm:$0xff]  }
  0x46   : > { %2588 = vmatpush3.bf16.msra.mxu1 %v2766_v17  ;;  %2363 = vmatprep.subr.bf16.mxu0 %v2767_v19  ;;  %v243_v17 = vld [vmem:[%s2967_s22] sm:$0xff]  ;;  %v303_v19 = vpack.c.bf16 %v1968_v14, %v1967_v13  ;;  %v2793_v9 = vld [vmem:[%s3582_s1 + $0x208] sm:$0xff]  }
  0x47   : > { %2554 = vmatmul.mubr.bf16.gmra.mxu1 %v3089_v15  ;;  %2589 = vmatprep.subr.bf16.mxu1 %v2837_v1  ;;  %v252_v13 = vld [vmem:[%s2967_s22 + $0x48] sm:$0xff]  ;;  %v2795_v14 = vld [vmem:[%s3582_s1 + $0x180] sm:$0xff]  }
  0x48   : > { %713 = vmatmul.mubr.bf16.gmra.mxu0 %v3092_v16  ;;  %2557 = vmatprep.mubr.msk.bf16.mxu1 %vm2838_vm0, %v2837_v1 }
  0x49   : > { %720 = vmatprep.mubr.bf16.mxu0 %v449_v18  ;;  %2364 = vmatpush3.bf16.msra.mxu0 %v2768_v24  ;;  %v244_v18 = vld [vmem:[%s2967_s22 + $0x8] sm:$0xff]  ;;  %v2774_v24 = vld [vmem:[%s3582_s1 + $0x1b8] sm:$0xff]  }
  0x4a   : > { %2590 = vmatpush3.bf16.msra.mxu1 %v2769_v25  ;;  %2365 = vmatprep.subr.bf16.mxu0 %v2770_v30  ;;  %v301_v22 = vpack.c.bf16 %v244_v18, %v243_v17  ;;  %v305_v25 = vpack.c.bf16 %v1952_v21, %v1951_v20  ;;  %v245_v30 = vld [vmem:[%s2967_s22 + $0x10] sm:$0xff]  ;;  %v1960_v18 = vld [vmem:[%s2967_s22 + $0x59] sm:$0xff] }
  0x4b   : > { %2591 = vmatprep.subr.bf16.mxu1 %v2837_v1  ;;  %v1959_v17 = vld [vmem:[%s2967_s22 + $0x51] sm:$0xff] }
  0x4c   : > { %v317_v20 = vpack.c.bf16 %v1960_v18, %v1959_v17  ;;  %v253_v21 = vld [vmem:[%s2967_s22 + $0x50] sm:$0xff]  ;;  %v2182_v18 = vld [vmem:[%s2967_s22 + $0x7e] sm:$0xff] }
  0x4d   : > { %2366 = vmatpush3.bf16.msra.mxu0 %v2771_v32  ;;  %v2777_v32 = vld [vmem:[%s3582_s1 + $0x1b0] sm:$0xff]  }
  0x4e   : > { %2592 = vmatpush3.bf16.msra.mxu1 %v2772_v33  ;;  %2438 = vmatprep.subr.bf16.mxu0 %v2773_v40  ;;  %v1953_v33 = vld [vmem:[%s2967_s22 + $0x21] sm:$0xff] }
  0x4f   : > { %2558 = vmatmul.mubr.bf16.gmra.mxu1 %v3117_v28  ;;  %2629 = vmatprep.subr.bf16.mxu1 %v2837_v1  ;;  %v308_v38 = vpack.c.bf16 %v1954_v34, %v1953_v33  ;;  %v2781_v40 = vld [vmem:[%s3582_s1 + $0x228] sm:$0xff]   ;;  %v258_v34 = vld [vmem:[%s2967_s22 + $0x78] sm:$0xff] }
  0x50   : > { %721 = vmatmul.mubr.bf16.gmra.mxu0 %v3119_v29  ;;  %2561 = vmatprep.mubr.msk.bf16.mxu1 %vm2838_vm0, %v2837_v1 }
  0x51   : > { %728 = vmatprep.mubr.bf16.mxu0 %v452_v31  ;;  %v246_v31 = vld [vmem:[%s2967_s22 + $0x18] sm:$0xff] }
  0x52   : > { %v304_v37 = vpack.c.bf16 %v246_v31, %v245_v30  ;;  %v1963_v30 = vld [vmem:[%s2967_s22 + $0x71] sm:$0xff]  ;;  %v1964_v31 = vld [vmem:[%s2967_s22 + $0x79] sm:$0xff] }
  0x53   : > { %v323_v33 = vpack.c.bf16 %v1964_v31, %v1963_v30  ;;  %v2186_v30 = vld [vmem:[%s2967_s22 + $0x9e] sm:$0xff] }
  0x57   : > { %2562 = vmatmul.mubr.bf16.gmra.mxu1 %v3145_v42 }
  0x58   : > { %729 = vmatmul.mubr.bf16.gmra.mxu0 %v3147_v43  ;;  %2565 = vmatprep.mubr.msk.bf16.mxu1 %vm2838_vm0, %v2837_v1 }
  0x59   : > { %736 = vmatprep.mubr.bf16.mxu0 %v455_v44  ;;  %v247_v44 = vld [vmem:[%s2967_s22 + $0x20] sm:$0xff] }
  0x5a   : > { %v307_v52 = vpack.c.bf16 %v248_v45, %v247_v44  ;;  %v2154_v44 = vld [vmem:[%s2967_s22 + $0x2d] sm:$0xff] }
  0x5f   : > { %2566 = vmatmul.mubr.bf16.gmra.mxu1 %v3159_v53 }
  0x60   : > { %737 = vmatmul.mubr.bf16.gmra.mxu0 %v3161_v54  ;;  %2569 = vmatprep.mubr.msk.bf16.mxu1 %vm2838_vm0, %v2837_v1 }
  0x61   : > { %744 = vmatprep.mubr.bf16.mxu0 %v458_v55  ;;  %v311_v55 = vpack.c.bf16 %v1956_v48, %v1955_v46  ;;  %v2155_v48 = vld [vmem:[%s2967_s22 + $0x35] sm:$0xff] }
  0x67   : > { %2570 = vmatmul.mubr.bf16.gmra.mxu1 %v3173_v62 }
  0x68   : > { %745 = vmatmul.mubr.bf16.gmra.mxu0 %v3175_v63  ;;  %2573 = vmatprep.mubr.msk.bf16.mxu1 %vm2838_vm0, %v2837_v1 }
  0x69   : > { %752 = vmatprep.mubr.bf16.mxu0 %v461_v2  ;;  %v2789_v2 = vld [vmem:[%s3582_s1 + $0x190] sm:$0xff]  }
  0x6f   : > { %2574 = vmatmul.mubr.bf16.gmra.mxu1 %v3187_v10 }
  0x70   : > { %753 = vmatmul.mubr.bf16.gmra.mxu0 %v460_v11  ;;  %2593 = vmatprep.mubr.msk.bf16.mxu1 %vm2838_vm0, %v2837_v1  ;;  %v2794_v11 = vld [vmem:[%s3582_s1 + $0x1c0] sm:$0xff]  }
  0x71   : > { %1042 = vmatprep.mubr.bf16.mxu0 %v302_v12  ;;  %v251_v12 = vld [vmem:[%s2967_s22 + $0x40] sm:$0xff] }
  0x77   : > { %2594 = vmatmul.mubr.bf16.vlgmr.msra.gmra.mxu1 %v303_v19  ;;  %v313_v19 = vpack.c.bf16 %v252_v13, %v251_v12  ;;  %v2163_v12 = vld [vmem:[%s2967_s22 + $0x75] sm:$0xff]  ;;  %v2164_v13 = vld [vmem:[%s2967_s22 + $0x7d] sm:$0xff] }
  0x78   : > { %1043 = vmatmul.mubr.bf16.vlgmr.msra.gmra.mxu0 %v301_v22  ;;  %2630 = vmatpush3.bf16.msra.mxu1 %v2775_v23  ;;  %v254_v22 = vld [vmem:[%s2967_s22 + $0x58] sm:$0xff]  ;;  %v1961_v23 = vld [vmem:[%s2967_s22 + $0x61] sm:$0xff]  ;;  %v1296_v17 = vpack.c.bf16 %v2164_v13, %v2163_v12 }
  0x79   : > { %2439 = vmatpush3.bf16.msra.mxu0 %v2774_v24  ;;  %2597 = vmatprep.mubr.msk.bf16.mxu1 %vm2838_vm0, %v2837_v1  ;;  %v1962_v24 = vld [vmem:[%s2967_s22 + $0x69] sm:$0xff] }
  0x7a   : > { %1050 = vmatprep.mubr.bf16.mxu0 %v305_v25  ;;  %2440 = vmatprep.subr.bf16.mxu0 %v2776_v26  ;;  %v316_v25 = vpack.c.bf16 %v254_v22, %v253_v21  ;;  %v320_v26 = vpack.c.bf16 %v1962_v24, %v1961_v23  ;;  %v2184_v22 = vld [vmem:[%s2967_s22 + $0x8e] sm:$0xff]  ;;  %v2168_v24 = vld [vmem:[%s2967_s22 + $0x9d] sm:$0xff] }
  0x7b   : > { %2631 = vmatprep.subr.bf16.mxu1 %v2837_v1  ;;  %v2167_v23 = vld [vmem:[%s2967_s22 + $0x95] sm:$0xff] }
  0x7c   : > { %2632 = vmatpush3.bf16.msra.mxu1 %v2778_v27  ;;  %v256_v27 = vld [vmem:[%s2967_s22 + $0x68] sm:$0xff] }
  0x7d   : > { %2441 = vmatpush3.bf16.msra.mxu0 %v2777_v32  ;;  %2633 = vmatprep.subr.bf16.mxu1 %v2837_v1 }
  0x7e   : > { %2442 = vmatprep.subr.bf16.mxu0 %v2779_v35  ;;  %v1965_v35 = vld [vmem:[%s2967_s22 + $0x81] sm:$0xff] }
  0x7f   : > { %2598 = vmatmul.mubr.bf16.gmra.mxu1 %v2997_v36  ;;  %v2784_v36 = vld [vmem:[%s3582_s1 + $0x220] sm:$0xff]  }
  0x80   : > { %1051 = vmatmul.mubr.bf16.gmra.mxu0 %v304_v37  ;;  %2601 = vmatprep.mubr.msk.bf16.mxu1 %vm2838_vm0, %v2837_v1  ;;  %v1966_v37 = vld [vmem:[%s2967_s22 + $0x89] sm:$0xff] }
  0x81   : > { %1058 = vmatprep.mubr.bf16.mxu0 %v308_v38  ;;  %2443 = vmatpush3.bf16.msra.mxu0 %v2780_v39  ;;  %v326_v39 = vpack.c.bf16 %v1966_v37, %v1965_v35 }
  0x82   : > { %2634 = vmatpush3.bf16.msra.mxu1 %v2781_v40  ;;  %2444 = vmatprep.subr.bf16.mxu0 %v2782_v41  ;;  %v260_v40 = vld [vmem:[%s2967_s22 + $0x88] sm:$0xff] }
  0x83   : > { %2635 = vmatprep.subr.bf16.mxu1 %v2837_v1  ;;  %v2153_v41 = vld [vmem:[%s2967_s22 + $0x25] sm:$0xff] }
  0x84   : > { %v1281_v46 = vpack.c.bf16 %v2154_v44, %v2153_v41 }
  0x85   : > { %2445 = vmatpush3.bf16.msra.mxu0 %v2783_v47  ;;  %v2172_v47 = vld [vmem:[%s2967_s22 + $0x2e] sm:$0xff] }
  0x86   : > { %2636 = vmatpush3.bf16.msra.mxu1 %v2784_v36  ;;  %2446 = vmatprep.subr.bf16.mxu0 %v2785_v49  ;;  %v2156_v36 = vld [vmem:[%s2967_s22 + $0x3d] sm:$0xff] }
  0x87   : > { %2602 = vmatmul.mubr.bf16.gmra.mxu1 %v3030_v51  ;;  %2637 = vmatprep.subr.bf16.mxu1 %v2837_v1  ;;  %v2790_v51 = vld [vmem:[%s3582_s1 + $0x210] sm:$0xff]  }
  0x88   : > { %1059 = vmatmul.mubr.bf16.gmra.mxu0 %v307_v52  ;;  %2605 = vmatprep.mubr.msk.bf16.mxu1 %vm2838_vm0, %v2837_v1  ;;  %v1284_v52 = vpack.c.bf16 %v2156_v36, %v2155_v48  ;;  %v2151_v36 = vld [vmem:[%s2967_s22 + $0xa4] sm:$0xff] }
  0x89   : > { %1066 = vmatprep.mubr.bf16.mxu0 %v311_v55  ;;  %2447 = vmatpush3.bf16.msra.mxu0 %v2786_v56  ;;  %v2174_v55 = vld [vmem:[%s2967_s22 + $0x3e] sm:$0xff] }
  0x8a   : > { %2638 = vmatpush3.bf16.msra.mxu1 %v2787_v57  ;;  %2448 = vmatprep.subr.bf16.mxu0 %v2788_v58  ;;  %v2157_v56 = vld [vmem:[%s2967_s22 + $0x45] sm:$0xff]  ;;  %v2158_v57 = vld [vmem:[%s2967_s22 + $0x4d] sm:$0xff] }
  0x8b   : > { %2639 = vmatprep.subr.bf16.mxu1 %v2837_v1  ;;  %v1287_v59 = vpack.c.bf16 %v2158_v57, %v2157_v56 }
  0x8d   : > { %2449 = vmatpush3.bf16.msra.mxu0 %v2789_v2  ;;  %v2160_v2 = vld [vmem:[%s2967_s22 + $0x5d] sm:$0xff] }
  0x8e   : > { %2640 = vmatpush3.bf16.msra.mxu1 %v2790_v51  ;;  %2450 = vmatprep.subr.bf16.mxu0 %v2791_v5  ;;  %v1290_v51 = vpack.c.bf16 %v2160_v2, %v2159_v61  ;;  %v2178_v5 = vld [vmem:[%s2967_s22 + $0x5e] sm:$0xff] }
  0x8f   : > { %2606 = vmatmul.mubr.bf16.gmra.mxu1 %v3064_v3  ;;  %2641 = vmatprep.subr.bf16.mxu1 %v2837_v1  ;;  %v2796_v3 = vld [vmem:[%s3582_s1 + $0x200] sm:$0xff]  }
  0x90   : > { %1067 = vmatmul.mubr.bf16.gmra.mxu0 %v310_v6  ;;  %2609 = vmatprep.mubr.msk.bf16.mxu1 %vm2838_vm0, %v2837_v1  ;;  %v2161_v6 = vld [vmem:[%s2967_s22 + $0x65] sm:$0xff] }
  0x91   : > { %1074 = vmatprep.mubr.bf16.mxu0 %v314_v7  ;;  %2451 = vmatpush3.bf16.msra.mxu0 %v2792_v8  ;;  %v2162_v7 = vld [vmem:[%s2967_s22 + $0x6d] sm:$0xff] }
  0x92   : > { %2642 = vmatpush3.bf16.msra.mxu1 %v2793_v9  ;;  %2452 = vmatprep.subr.bf16.mxu0 %v2794_v11  ;;  %v1293_v9 = vpack.c.bf16 %v2162_v7, %v2161_v6  ;;  %v2180_v11 = vld [vmem:[%s2967_s22 + $0x6e] sm:$0xff] }
  0x93   : > { %2643 = vmatprep.subr.bf16.mxu1 %v2837_v1 }
  0x95   : > { %2453 = vmatpush3.bf16.msra.mxu0 %v2795_v14 }
  0x96   : > { %2644 = vmatpush3.bf16.msra.mxu1 %v2796_v3  ;;  %v2165_v3 = vld [vmem:[%s2967_s22 + $0x85] sm:$0xff] }
  0x97   : > { %2610 = vmatmul.mubr.bf16.gmra.mxu1 %v3092_v16  ;;  %v255_v16 = vld [vmem:[%s2967_s22 + $0x60] sm:$0xff] }
  0x98   : > { %1075 = vmatmul.mubr.bf16.gmra.mxu0 %v313_v19  ;;  %2613 = vmatprep.mubr.msk.bf16.mxu1 %vm2838_vm0, %v2837_v1  ;;  %v319_v32 = vpack.c.bf16 %v256_v27, %v255_v16  ;;  %v2166_v19 = vld [vmem:[%s2967_s22 + $0x8d] sm:$0xff] }
  0x99   : > { %1082 = vmatprep.mubr.bf16.mxu0 %v317_v20  ;;  %v1299_v21 = vpack.c.bf16 %v2166_v19, %v2165_v3 }
  0x9f   : > { %2614 = vmatmul.mubr.bf16.gmra.mxu1 %v3119_v29  ;;  %v257_v29 = vld [vmem:[%s2967_s22 + $0x70] sm:$0xff] }
  0xa0   : > { %1083 = vmatmul.mubr.bf16.gmra.mxu0 %v316_v25  ;;  %2617 = vmatprep.mubr.msk.bf16.mxu1 %vm2838_vm0, %v2837_v1  ;;  %v322_v38 = vpack.c.bf16 %v258_v34, %v257_v29  ;;  %v2170_v29 = vld [vmem:[%s2967_s22 + $0xad] sm:$0xff] }
  0xa1   : > { %1090 = vmatprep.mubr.bf16.mxu0 %v320_v26  ;;  %v1302_v26 = vpack.c.bf16 %v2168_v24, %v2167_v23 }
  0xa7   : > { %2618 = vmatmul.mubr.bf16.gmra.mxu1 %v3147_v43  ;;  %v259_v43 = vld [vmem:[%s2967_s22 + $0x80] sm:$0xff] }
  0xa8   : > { %1091 = vmatmul.mubr.bf16.gmra.mxu0 %v319_v32  ;;  %2621 = vmatprep.mubr.msk.bf16.mxu1 %vm2838_vm0, %v2837_v1  ;;  %v325_v45 = vpack.c.bf16 %v260_v40, %v259_v43 }
  0xa9   : > { %1098 = vmatprep.mubr.bf16.mxu0 %v323_v33  ;;  %v2169_v33 = vld [vmem:[%s2967_s22 + $0xa5] sm:$0xff] }
  0xaa   : > { %v1305_v43 = vpack.c.bf16 %v2170_v29, %v2169_v33 }
  0xaf   : > { %2622 = vmatmul.mubr.bf16.gmra.mxu1 %v3161_v54  ;;  %v2171_v54 = vld [vmem:[%s2967_s22 + $0x26] sm:$0xff] }
  0xb0   : > { %1099 = vmatmul.mubr.bf16.gmra.mxu0 %v322_v38  ;;  %2625 = vmatprep.mubr.msk.bf16.mxu1 %vm2838_vm0, %v2837_v1  ;;  %v1282_v49 = vpack.c.bf16 %v2172_v47, %v2171_v54  ;;  %v2188_v54 = vld [vmem:[%s2967_s22 + $0xae] sm:$0xff] }
  0xb1   : > { %1106 = vmatprep.mubr.bf16.mxu0 %v326_v39 }
  0xb7   : > { %2626 = vmatmul.mubr.bf16.gmra.mxu1 %v3175_v63  ;;  %v2173_v63 = vld [vmem:[%s2967_s22 + $0x36] sm:$0xff] }
  0xb8   : > { %1107 = vmatmul.mubr.bf16.gmra.mxu0 %v325_v45  ;;  %2645 = vmatprep.mubr.msk.bf16.mxu1 %vm2838_vm0, %v2837_v1  ;;  %v1285_v58 = vpack.c.bf16 %v2174_v55, %v2173_v63 }
  0xb9   : > { %1532 = vmatprep.mubr.bf16.mxu0 %v1281_v46  ;;  %v2187_v46 = vld [vmem:[%s2967_s22 + $0xa6] sm:$0xff] }
  0xba   : > { %v1306_v56 = vpack.c.bf16 %v2188_v54, %v2187_v46 }
  0xbf   : > { %2646 = vmatmul.mubr.bf16.vlgmr.msra.gmra.mxu1 %v1282_v49  ;;  %v2152_v49 = vld [vmem:[%s2967_s22 + $0xac] sm:$0xff] }
  0xc0   : > { %1533 = vmatmul.mubr.bf16.vlgmr.msra.gmra.mxu0 %v3027_v50  ;;  %2649 = vmatprep.mubr.msk.bf16.mxu1 %vm2838_vm0, %v2837_v1  ;;  %v2175_v50 = vld [vmem:[%s2967_s22 + $0x46] sm:$0xff] }
  0xc1   : > { %1540 = vmatprep.mubr.bf16.mxu0 %v1284_v52  ;;  %v1288_v4 = vpack.c.bf16 %v2176_v60, %v2175_v50 }
  0xc7   : > { %2650 = vmatmul.mubr.bf16.gmra.mxu1 %v1285_v58  ;;  %v1304_v58 = vpack.c.bf16 %v2152_v49, %v2151_v36 }
  0xc8   : > { %1541 = vmatmul.mubr.bf16.gmra.mxu0 %v3058_v0  ;;  %2653 = vmatprep.mubr.msk.bf16.mxu1 %vm2838_vm0, %v2837_v1  ;;  %v2177_v0 = vld [vmem:[%s2967_s22 + $0x56] sm:$0xff] }
  0xc9   : > { %1548 = vmatprep.mubr.bf16.mxu0 %v1287_v59  ;;  %v1291_v8 = vpack.c.bf16 %v2178_v5, %v2177_v0 }
  0xcf   : > { %2654 = vmatmul.mubr.bf16.gmra.mxu1 %v1288_v4 }
  0xd0   : > { %1549 = vmatmul.mubr.bf16.gmra.mxu0 %v3089_v15  ;;  %2657 = vmatprep.mubr.msk.bf16.mxu1 %vm2838_vm0, %v2837_v1  ;;  %v2179_v15 = vld [vmem:[%s2967_s22 + $0x66] sm:$0xff] }
  0xd1   : > { %1556 = vmatprep.mubr.bf16.mxu0 %v1290_v51  ;;  %v1294_v14 = vpack.c.bf16 %v2180_v11, %v2179_v15 }
  0xd7   : > { %2658 = vmatmul.mubr.bf16.gmra.mxu1 %v1291_v8 }
  0xd8   : > { %1557 = vmatmul.mubr.bf16.gmra.mxu0 %v3117_v28  ;;  %2661 = vmatprep.mubr.msk.bf16.mxu1 %vm2838_vm0, %v2837_v1  ;;  %v2181_v28 = vld [vmem:[%s2967_s22 + $0x76] sm:$0xff] }
  0xd9   : > { %1564 = vmatprep.mubr.bf16.mxu0 %v1293_v9  ;;  %v1297_v20 = vpack.c.bf16 %v2182_v18, %v2181_v28 }
  0xdf   : > { %2662 = vmatmul.mubr.bf16.gmra.mxu1 %v1294_v14 }
  0xe0   : > { %1565 = vmatmul.mubr.bf16.gmra.mxu0 %v3145_v42  ;;  %2665 = vmatprep.mubr.msk.bf16.mxu1 %vm2838_vm0, %v2837_v1  ;;  %v2183_v42 = vld [vmem:[%s2967_s22 + $0x86] sm:$0xff] }
  0xe1   : > { %1572 = vmatprep.mubr.bf16.mxu0 %v1296_v17  ;;  %v1300_v25 = vpack.c.bf16 %v2184_v22, %v2183_v42 }
  0xe7   : > { %2666 = vmatmul.mubr.bf16.gmra.mxu1 %v1297_v20 }
  0xe8   : > { %1573 = vmatmul.mubr.bf16.gmra.mxu0 %v3159_v53  ;;  %2669 = vmatprep.mubr.msk.bf16.mxu1 %vm2838_vm0, %v2837_v1  ;;  %v2185_v53 = vld [vmem:[%s2967_s22 + $0x96] sm:$0xff]  ;;  %s227_s22 = smul.u32 18, %s2819_s12 }
  0xe9   : > { %1580 = vmatprep.mubr.bf16.mxu0 %v1299_v21  ;;  %v1303_v37 = vpack.c.bf16 %v2186_v30, %v2185_v53 }
  0xea   : > { %p230_p6 = scmp.lt.s32.totalorder %s227_s22, 35 }
  0xec   : > { %s3598_s22 = smov (!%p230_p6, %s227_s22), 35 }
  0xed   : > { %s236_s12 = sadd.s32 %s2682_s7, %s3598_s22 }
  0xee   : > { %s1948_s13 = sshll.u32 %s236_s12, 3 }
  0xef   : > { %v795_v16 = vpop.f32.mrf.mxu1  ;;  %2670 = vmatmul.mubr.bf16.gmra.mxu1 %v1300_v25  ;;  %s3494_s19 = scalar_lea.vmem %s3584_s3, %s1948_s13 }
  0xf0   : > { %v2280_v27 = vpop.f32.mrf.mxu0  ;;  %1581 = vmatmul.mubr.bf16.gmra.mxu0 %v3173_v62  ;;  %2673 = vmatprep.mubr.msk.bf16.mxu1 %vm2838_vm0, %v2837_v1 }
  0xf1   : > { %v2543_v31 = vpop.f32.mrf.mxu1  ;;  %1588 = vmatprep.mubr.bf16.mxu0 %v1302_v26 }
  0xf2   : > { %v2281_v32 = vpop.f32.mrf.mxu0 }
  0xf3   : > { %v2282_v34 = vadd.f32 %v2281_v32, %v2280_v27  ;;  %v798_v35 = vpop.f32.mrf.mxu1 }
  0xf4   : > { %v2283_v38 = vpop.f32.mrf.mxu0 }
  0xf5   : > { %v3385_v39 = vadd.f32 %v2282_v34, %v795_v16  ;;  %v2544_v62 = vpop.f32.mrf.mxu1 }
  0xf6   : > { %v2284_v40 = vpop.f32.mrf.mxu0 }
  0xf7   : > { %v2285_v41 = vadd.f32 %v2284_v40, %v2283_v38  ;;  %v803_v44 = vpop.f32.mrf.mxu1  ;;  %2674 = vmatmul.mubr.bf16.gmra.mxu1 %v1303_v37 }
  0xf8   : > { %v2286_v45 = vpop.f32.mrf.mxu0  ;;  %1589 = vmatmul.mubr.bf16.gmra.mxu0 %v3187_v10  ;;  %2677 = vmatprep.mubr.msk.bf16.mxu1 %vm2838_vm0, %v2837_v1 }
  0xf9   : > { %v3392_v47 = vadd.f32 %v2285_v41, %v798_v35  ;;  %v2547_v48 = vpop.f32.mrf.mxu1  ;;  %1596 = vmatprep.mubr.bf16.mxu0 %v1305_v43 }
  0xfa   : > { %v2287_v52 = vpop.f32.mrf.mxu0 }
  0xfb   : > { %v2288_v63 = vadd.f32 %v2287_v52, %v2286_v45  ;;  %v806_v55 = vpop.f32.mrf.mxu1 }
  0xfc   : > { %v2289_v57 = vpop.f32.mrf.mxu0 }
  0xfd   : > { %v3396_v59 = vadd.f32 %v2288_v63, %v803_v44  ;;  %v2548_v10 = vpop.f32.mrf.mxu1 }
  0xfe   : > { %v2290_v50 = vpop.f32.mrf.mxu0 }
  0xff   : > { %v2291_v60 = vadd.f32 %v2290_v50, %v2289_v57  ;;  %v811_v1 = vpop.f32.mrf.mxu1  ;;  %2678 = vmatmul.mubr.bf16.gmra.mxu1 %v1306_v56 }
 0x100   : > { %v2292_v61 = vpop.f32.mrf.mxu0  ;;  %1597 = vmatmul.mubr.bf16.gmra.mxu0 %v1304_v58 }
 0x101   : > { %v3398_v2 = vadd.f32 %v2291_v60, %v806_v55  ;;  %v2551_v4 = vpop.f32.mrf.mxu1 }
 0x102   : > { %v2293_v51 = vpop.f32.mrf.mxu0 }
 0x103   : > { %v2294_v0 = vadd.f32 %v2293_v51, %v2292_v61  ;;  %v814_v5 = vpop.f32.mrf.mxu1 }
 0x104   : > { %v2295_v6 = vpop.f32.mrf.mxu0 }
 0x105   : > { %v3400_v7 = vadd.f32 %v2294_v0, %v811_v1  ;;  %v2552_v8 = vpop.f32.mrf.mxu1 }
 0x106   : > { %v2296_v9 = vpop.f32.mrf.mxu0 }
 0x107   : > { %v2297_v15 = vadd.f32 %v2296_v9, %v2295_v6  ;;  %v819_v11 = vpop.f32.mrf.mxu1 }
 0x108   : > { %v2298_v12 = vpop.f32.mrf.mxu0 }
 0x109   : > { %v3402_v13 = vadd.f32 %v2297_v15, %v814_v5  ;;  %v2555_v14 = vpop.f32.mrf.mxu1 }
 0x10a   : > { %v2299_v17 = vpop.f32.mrf.mxu0 }
 0x10b   : > { %v2300_v28 = vadd.f32 %v2299_v17, %v2298_v12  ;;  %v822_v18 = vpop.f32.mrf.mxu1 }
 0x10c   : > { %v2301_v3 = vpop.f32.mrf.mxu0 }
 0x10d   : > { %v3404_v19 = vadd.f32 %v2300_v28, %v819_v11  ;;  %v2556_v20 = vpop.f32.mrf.mxu1 }
 0x10e   : > { %v2302_v21 = vpop.f32.mrf.mxu0 }
 0x10f   : > { %v2303_v42 = vadd.f32 %v2302_v21, %v2301_v3  ;;  %v827_v22 = vpop.f32.mrf.mxu1 }
 0x110   : > { %v2304_v23 = vpop.f32.mrf.mxu0 }
 0x111   : > { %v3406_v24 = vadd.f32 %v2303_v42, %v822_v18  ;;  %v2559_v25 = vpop.f32.mrf.mxu1 }
 0x112   : > { %v2305_v26 = vpop.f32.mrf.mxu0 }
 0x113   : > { %v2306_v16 = vadd.f32 %v2305_v26, %v2304_v23  ;;  %v830_v27 = vpop.f32.mrf.mxu1 }
 0x114   : > { %v2307_v53 = vpop.f32.mrf.mxu0 }
 0x115   : > { %v3408_v30 = vadd.f32 %v2306_v16, %v827_v22  ;;  %v2560_v31 = vpop.f32.mrf.mxu1 }
 0x116   : > { %v2308_v32 = vpop.f32.mrf.mxu0 }
 0x117   : > { %v2309_v33 = vadd.f32 %v2308_v32, %v2307_v53  ;;  %v835_v29 = vpop.f32.mrf.mxu1 }
 0x118   : > { %v2310_v34 = vpop.f32.mrf.mxu0 }
 0x119   : > { %v3410_v35 = vadd.f32 %v2309_v33, %v830_v27  ;;  %v2563_v37 = vpop.f32.mrf.mxu1 }
 0x11a   : > { %v2311_v38 = vpop.f32.mrf.mxu0 }
 0x11b   : > { %v2312_v62 = vadd.f32 %v2311_v38, %v2310_v34  ;;  %v838_v43 = vpop.f32.mrf.mxu1 }
 0x11c   : > { %v2313_v40 = vpop.f32.mrf.mxu0 }
 0x11d   : > { %v3412_v41 = vadd.f32 %v2312_v62, %v835_v29  ;;  %v2564_v44 = vpop.f32.mrf.mxu1 }
 0x11e   : > { %v2314_v45 = vpop.f32.mrf.mxu0 }
 0x11f   : > { %v2315_v46 = vadd.f32 %v2314_v45, %v2313_v40  ;;  %v843_v54 = vpop.f32.mrf.mxu1 }
 0x120   : > { %v2316_v48 = vpop.f32.mrf.mxu0 }
 0x121   : > { %v3414_v36 = vadd.f32 %v2315_v46, %v838_v43  ;;  %v2567_v49 = vpop.f32.mrf.mxu1 }
 0x122   : > { %v2317_v52 = vpop.f32.mrf.mxu0 }
 0x123   : > { %v2318_v63 = vadd.f32 %v2317_v52, %v2316_v48  ;;  %v846_v55 = vpop.f32.mrf.mxu1 }
 0x124   : > { %v2319_v56 = vpop.f32.mrf.mxu0 }
 0x125   : > { %v3416_v57 = vadd.f32 %v2318_v63, %v843_v54  ;;  %v2568_v58 = vpop.f32.mrf.mxu1 }
 0x126   : > { %v2320_v10 = vpop.f32.mrf.mxu0 }
 0x127   : > { %v2321_v50 = vadd.f32 %v2320_v10, %v2319_v56  ;;  %v851_v60 = vpop.f32.mrf.mxu1 }
 0x128   : > { %v2322_v1 = vpop.f32.mrf.mxu0 }
 0x129   : > { %v3418_v61 = vadd.f32 %v2321_v50, %v846_v55  ;;  %v2571_v4 = vpop.f32.mrf.mxu1 }
 0x12a   : > { %v2323_v51 = vpop.f32.mrf.mxu0 }
 0x12b   : > { %v2324_v0 = vadd.f32 %v2323_v51, %v2322_v1  ;;  %v854_v5 = vpop.f32.mrf.mxu1 }
 0x12c   : > { %v2325_v6 = vpop.f32.mrf.mxu0 }
 0x12d   : > { %v3420_v8 = vadd.f32 %v2324_v0, %v851_v60  ;;  %v2572_v9 = vpop.f32.mrf.mxu1 }
 0x12e   : > { %v2326_v15 = vpop.f32.mrf.mxu0 }
 0x12f   : > { %v2327_v11 = vadd.f32 %v2326_v15, %v2325_v6  ;;  %v859_v12 = vpop.f32.mrf.mxu1 }
 0x130   : > { %v2328_v14 = vpop.f32.mrf.mxu0 }
 0x131   : > { %v3422_v17 = vadd.f32 %v2327_v11, %v854_v5  ;;  %v2575_v28 = vpop.f32.mrf.mxu1 }
 0x132   : > { %v2329_v18 = vpop.f32.mrf.mxu0 }
 0x133   : > { %v2330_v3 = vadd.f32 %v2329_v18, %v2328_v14  ;;  %v862_v20 = vpop.f32.mrf.mxu1 }
 0x134   : > { %v2331_v21 = vpop.f32.mrf.mxu0 }
 0x135   : > { %v3424_v42 = vadd.f32 %v2330_v3, %v859_v12  ;;  %v2576_v22 = vpop.f32.mrf.mxu1 }
 0x136   : > { %v2332_v23 = vpop.f32.mrf.mxu0 }
 0x137   : > { %v2333_v25 = vadd.f32 %v2332_v23, %v2331_v21  ;;  %v1149_v26 = vpop.f32.mrf.mxu1 }
 0x138   : > { %v2367_v16 = vpop.f32.mrf.mxu0 }
 0x139   : > { %v3426_v27 = vadd.f32 %v2333_v25, %v862_v20  ;;  %v2595_v53 = vpop.f32.mrf.mxu1 }
 0x13a   : > { %v2368_v31 = vpop.f32.mrf.mxu0 }
 0x13b   : > { %v2369_v32 = vadd.f32 %v2368_v31, %v2367_v16  ;;  %v1152_v33 = vpop.f32.mrf.mxu1 }
 0x13c   : > { %v2370_v29 = vpop.f32.mrf.mxu0 }
 0x13d   : > { %v1045_v34 = vadd.f32 %v2369_v32, %v3385_v39  ;;  %v2596_v37 = vpop.f32.mrf.mxu1 }
 0x13e   : > { %v2371_v38 = vpop.f32.mrf.mxu0 }
 0x13f   : > { %v3429_v62 = vadd.f32 %v1149_v26, %v1045_v34  ;;  %v2372_v43 = vadd.f32 %v2371_v38, %v2370_v29  ;;  %v1157_v40 = vpop.f32.mrf.mxu1 }
 0x140   : > { %v2373_v44 = vpop.f32.mrf.mxu0 }
 0x141   : > { %v1048_v45 = vadd.f32 %v2372_v43, %v3392_v47  ;;  %v2599_v46 = vpop.f32.mrf.mxu1 }
 0x142   : > { %v2374_v54 = vpop.f32.mrf.mxu0 }
 0x143   : > { %v3432_v48 = vadd.f32 %v1152_v33, %v1048_v45  ;;  %v2375_v49 = vadd.f32 %v2374_v54, %v2373_v44  ;;  %v1160_v52 = vpop.f32.mrf.mxu1 }
 0x144   : > { %v2376_v63 = vpop.f32.mrf.mxu0 }
 0x145   : > { %v1053_v55 = vadd.f32 %v2375_v49, %v3396_v59  ;;  %v2600_v56 = vpop.f32.mrf.mxu1 }
 0x146   : > { %v2377_v39 = vpop.f32.mrf.mxu0 }
 0x147   : > { %v3435_v58 = vadd.f32 %v1157_v40, %v1053_v55  ;;  %v2378_v10 = vadd.f32 %v2377_v39, %v2376_v63  ;;  %v1165_v50 = vpop.f32.mrf.mxu1 }
 0x148   : > { %v2379_v60 = vpop.f32.mrf.mxu0 }
 0x149   : > { %v1056_v1 = vadd.f32 %v2378_v10, %v3398_v2  ;;  %v2603_v4 = vpop.f32.mrf.mxu1 }
 0x14a   : > { %v2380_v47 = vpop.f32.mrf.mxu0 }
 0x14b   : > { %v3438_v51 = vadd.f32 %v1160_v52, %v1056_v1  ;;  %v2381_v0 = vadd.f32 %v2380_v47, %v2379_v60  ;;  %v1168_v5 = vpop.f32.mrf.mxu1 }
 0x14c   : > { %v2382_v6 = vpop.f32.mrf.mxu0 }
 0x14d   : > { %v1061_v9 = vadd.f32 %v2381_v0, %v3400_v7  ;;  %v2604_v15 = vpop.f32.mrf.mxu1 }
 0x14e   : > { %v2383_v59 = vpop.f32.mrf.mxu0 }
 0x14f   : > { %v3441_v11 = vadd.f32 %v1165_v50, %v1061_v9  ;;  %v2384_v12 = vadd.f32 %v2383_v59, %v2382_v6  ;;  %v1173_v14 = vpop.f32.mrf.mxu1 }
 0x150   : > { %v2385_v28 = vpop.f32.mrf.mxu0 }
 0x151   : > { %v1064_v18 = vadd.f32 %v2384_v12, %v3402_v13  ;;  %v2607_v3 = vpop.f32.mrf.mxu1 }
 0x152   : > { %v2386_v2 = vpop.f32.mrf.mxu0 }
 0x153   : > { %v3444_v20 = vadd.f32 %v1168_v5, %v1064_v18  ;;  %v2387_v21 = vadd.f32 %v2386_v2, %v2385_v28  ;;  %v1176_v22 = vpop.f32.mrf.mxu1 }
 0x154   : > { %v2388_v23 = vpop.f32.mrf.mxu0 }
 0x155   : > { %v1069_v25 = vadd.f32 %v2387_v21, %v3404_v19  ;;  %v2608_v26 = vpop.f32.mrf.mxu1 }
 0x156   : > { %v2389_v7 = vpop.f32.mrf.mxu0 }
 0x157   : > { %v3447_v16 = vadd.f32 %v1173_v14, %v1069_v25  ;;  %v2390_v53 = vadd.f32 %v2389_v7, %v2388_v23  ;;  %v1181_v31 = vpop.f32.mrf.mxu1 }
 0x158   : > { %v2391_v32 = vpop.f32.mrf.mxu0 }
 0x159   : > { %v1072_v33 = vadd.f32 %v2390_v53, %v3406_v24  ;;  %v2611_v29 = vpop.f32.mrf.mxu1 }
 0x15a   : > { %v2392_v13 = vpop.f32.mrf.mxu0 }
 0x15b   : > { %v3450_v34 = vadd.f32 %v1176_v22, %v1072_v33  ;;  %v2393_v37 = vadd.f32 %v2392_v13, %v2391_v32  ;;  %v1184_v38 = vpop.f32.mrf.mxu1 }
 0x15c   : > { %v2394_v43 = vpop.f32.mrf.mxu0 }
 0x15d   : > { %v1077_v40 = vadd.f32 %v2393_v37, %v3408_v30  ;;  %v2612_v44 = vpop.f32.mrf.mxu1 }
 0x15e   : > { %v2395_v19 = vpop.f32.mrf.mxu0 }
 0x15f   : > { %v3453_v45 = vadd.f32 %v1181_v31, %v1077_v40  ;;  %v2396_v46 = vadd.f32 %v2395_v19, %v2394_v43  ;;  %v1189_v54 = vpop.f32.mrf.mxu1 }
 0x160   : > { %v2397_v49 = vpop.f32.mrf.mxu0 }
 0x161   : > { %v1080_v52 = vadd.f32 %v2396_v46, %v3410_v35  ;;  %v2615_v63 = vpop.f32.mrf.mxu1 }
 0x162   : > { %v2398_v24 = vpop.f32.mrf.mxu0 }
 0x163   : > { %v3456_v55 = vadd.f32 %v1184_v38, %v1080_v52  ;;  %v2399_v56 = vadd.f32 %v2398_v24, %v2397_v49  ;;  %v1192_v39 = vpop.f32.mrf.mxu1 }
 0x164   : > { %v2400_v10 = vpop.f32.mrf.mxu0 }
 0x165   : > { %v1085_v50 = vadd.f32 %v2399_v56, %v3412_v41  ;;  %v2616_v60 = vpop.f32.mrf.mxu1 }
 0x166   : > { %v2401_v30 = vpop.f32.mrf.mxu0 }
 0x167   : > { %v3459_v1 = vadd.f32 %v1189_v54, %v1085_v50  ;;  %v2402_v4 = vadd.f32 %v2401_v30, %v2400_v10  ;;  %v1197_v47 = vpop.f32.mrf.mxu1 }
 0x168   : > { %v2403_v0 = vpop.f32.mrf.mxu0 }
 0x169   : > { %v1088_v5 = vadd.f32 %v2402_v4, %v3414_v36  ;;  %v2619_v6 = vpop.f32.mrf.mxu1 }
 0x16a   : > { %v2404_v35 = vpop.f32.mrf.mxu0 }
 0x16b   : > { %v3462_v9 = vadd.f32 %v1192_v39, %v1088_v5  ;;  %v2405_v15 = vadd.f32 %v2404_v35, %v2403_v0  ;;  %v1200_v59 = vpop.f32.mrf.mxu1  ;;  %v3487_v0 = vld [vmem:[%s3583_s2] ss:$0 sm:$0xff] }
 0x16c   : > { %v2406_v12 = vpop.f32.mrf.mxu0 }
 0x16d   : > { %v1093_v14 = vadd.f32 %v2405_v15, %v3416_v57  ;;  %v2620_v28 = vpop.f32.mrf.mxu1 }
 0x16e   : > { %v2407_v41 = vpop.f32.mrf.mxu0 }
 0x16f   : > { %v3465_v18 = vadd.f32 %v1197_v47, %v1093_v14  ;;  %v2408_v3 = vadd.f32 %v2407_v41, %v2406_v12  ;;  %v1205_v2 = vpop.f32.mrf.mxu1 }
 0x170   : > { %v2409_v21 = vpop.f32.mrf.mxu0 }
 0x171   : > { %v1096_v22 = vadd.f32 %v2408_v3, %v3418_v61  ;;  %v2623_v36 = vpop.f32.mrf.mxu1 }
 0x172   : > { %v2410_v23 = vpop.f32.mrf.mxu0 }
 0x173   : > { %v3468_v25 = vadd.f32 %v1200_v59, %v1096_v22  ;;  %v2411_v26 = vadd.f32 %v2410_v23, %v2409_v21  ;;  %v1208_v7 = vpop.f32.mrf.mxu1 }
 0x174   : > { %v2412_v53 = vpop.f32.mrf.mxu0 }
 0x175   : > { %v1101_v31 = vadd.f32 %v2411_v26, %v3420_v8  ;;  %v2624_v57 = vpop.f32.mrf.mxu1 }
 0x176   : > { %v2413_v32 = vpop.f32.mrf.mxu0 }
 0x177   : > { %v3471_v33 = vadd.f32 %v1205_v2, %v1101_v31  ;;  %v2414_v29 = vadd.f32 %v2413_v32, %v2412_v53  ;;  %v1213_v13 = vpop.f32.mrf.mxu1 }
 0x178   : > { %v2415_v37 = vpop.f32.mrf.mxu0 }
 0x179   : > { %v1104_v61 = vadd.f32 %v2414_v29, %v3422_v17  ;;  %v2627_v38 = vpop.f32.mrf.mxu1 }
 0x17a   : > { %v2416_v43 = vpop.f32.mrf.mxu0 }
 0x17b   : > { %v3475_v40 = vadd.f32 %v1208_v7, %v1104_v61  ;;  %v2417_v44 = vadd.f32 %v2416_v43, %v2415_v37  ;;  %v1216_v19 = vpop.f32.mrf.mxu1 }
 0x17c   : > { %v2418_v46 = vpop.f32.mrf.mxu0 }
 0x17d   : > { %v1109_v8 = vadd.f32 %v2417_v44, %v3424_v42  ;;  %v2628_v54 = vpop.f32.mrf.mxu1 }
 0x17e   : > { %v2419_v49 = vpop.f32.mrf.mxu0 }
 0x17f   : > { %v3478_v52 = vadd.f32 %v1213_v13, %v1109_v8  ;;  %v2420_v63 = vadd.f32 %v2419_v49, %v2418_v46  ;;  %v1639_v24 = vpop.f32.mrf.mxu1 }
 0x180   : > { %v2454_v56 = vpop.f32.mrf.mxu0 }
 0x181   : > { %v1112_v17 = vadd.f32 %v2420_v63, %v3426_v27  ;;  %v2647_v39 = vpop.f32.mrf.mxu1 }
 0x182   : > { %v2455_v10 = vpop.f32.mrf.mxu0 }
 0x183   : > { %v3482_v50 = vadd.f32 %v1216_v19, %v1112_v17  ;;  %v2456_v60 = vadd.f32 %v2455_v10, %v2454_v56  ;;  %v1642_v30 = vpop.f32.mrf.mxu1 }
 0x184   : > { %v2457_v4 = vpop.f32.mrf.mxu0 }
 0x185   : > { %v1640_v42 = vadd.f32 %v2456_v60, %v1639_v24  ;;  %v2648_v47 = vpop.f32.mrf.mxu1 }
 0x186   : > { %v2458_v5 = vpop.f32.mrf.mxu0 }
 0x187   : > { %v1710_v6 = vadd.f32 %v1640_v42, %v3429_v62  ;;  %v2459_v27 = vadd.f32 %v2458_v5, %v2457_v4  ;;  %v1647_v35 = vpop.f32.mrf.mxu1 }
 0x188   : > { %v2460_v15 = vpop.f32.mrf.mxu0 }
 0x189   : > { %v1735_v59 = vadd.f32 %v3487_v0, %v1710_v6  ;;  %v1643_v12 = vadd.f32 %v2459_v27, %v1642_v30  ;;  %v2651_v14 = vpop.f32.mrf.mxu1 }
 0x18a   : > { %v2461_v28 = vpop.f32.mrf.mxu0 }
 0x18b   : > { %v1753_v41 = vmax.f32 %v1735_v59, 0.0  ;;  %v1711_v3 = vadd.f32 %v1643_v12, %v3432_v48  ;;  %v2462_v62 = vadd.f32 %v2461_v28, %v2460_v15  ;;  %v1650_v2 = vpop.f32.mrf.mxu1 }
 0x18c   : > { %v2463_v21 = vpop.f32.mrf.mxu0 }
 0x18d   : > { %1772 = vst.msk [vmem:[%s3494_s19] sm:$0xff] %vm1771_vm1, %v1753_v41  ;;  %v1736_v22 = vadd.f32 %v3487_v0, %v1711_v3  ;;  %v1648_v36 = vadd.f32 %v2462_v62, %v1647_v35  ;;  %v2652_v23 = vpop.f32.mrf.mxu1 }
 0x18e   : > { %v2464_v26 = vpop.f32.mrf.mxu0 }
 0x18f   : > { %v1754_v7 = vmax.f32 %v1736_v22, 0.0  ;;  %v1712_v53 = vadd.f32 %v1648_v36, %v3435_v58  ;;  %v2465_v31 = vadd.f32 %v2464_v26, %v2463_v21  ;;  %v1655_v57 = vpop.f32.mrf.mxu1 }
 0x190   : > { %v2466_v32 = vpop.f32.mrf.mxu0 }
 0x191   : > { %1773 = vst.msk [vmem:[%s3494_s19 + $0x8] sm:$0xff] %vm1771_vm1, %v1754_v7  ;;  %v1737_v48 = vadd.f32 %v3487_v0, %v1712_v53  ;;  %v1651_v29 = vadd.f32 %v2465_v31, %v1650_v2  ;;  %v2655_v13 = vpop.f32.mrf.mxu1 }
 0x192   : > { %v2467_v37 = vpop.f32.mrf.mxu0 }
 0x193   : > { %v1755_v61 = vmax.f32 %v1737_v48, 0.0  ;;  %v1713_v38 = vadd.f32 %v1651_v29, %v3438_v51  ;;  %v2468_v43 = vadd.f32 %v2467_v37, %v2466_v32  ;;  %v1658_v44 = vpop.f32.mrf.mxu1 }
 0x194   : > { %v2469_v19 = vpop.f32.mrf.mxu0 }
 0x195   : > { %1774 = vst.msk [vmem:[%s3494_s19 + $0x10] sm:$0xff] %vm1771_vm1, %v1755_v61  ;;  %v1738_v58 = vadd.f32 %v3487_v0, %v1713_v38  ;;  %v1656_v46 = vadd.f32 %v2468_v43, %v1655_v57  ;;  %v2656_v8 = vpop.f32.mrf.mxu1 }
 0x196   : > { %v2470_v54 = vpop.f32.mrf.mxu0 }
 0x197   : > { %v1756_v49 = vmax.f32 %v1738_v58, 0.0  ;;  %v1714_v63 = vadd.f32 %v1656_v46, %v3441_v11  ;;  %v2471_v24 = vadd.f32 %v2470_v54, %v2469_v19  ;;  %v1663_v56 = vpop.f32.mrf.mxu1 }
 0x198   : > { %v2472_v17 = vpop.f32.mrf.mxu0 }
 0x199   : > { %1775 = vst.msk [vmem:[%s3494_s19 + $0x18] sm:$0xff] %vm1771_vm1, %v1756_v49  ;;  %v1739_v51 = vadd.f32 %v3487_v0, %v1714_v63  ;;  %v1659_v39 = vadd.f32 %v2471_v24, %v1658_v44  ;;  %v2659_v10 = vpop.f32.mrf.mxu1 }
 0x19a   : > { %v2473_v60 = vpop.f32.mrf.mxu0 }
 0x19b   : > { %v1757_v30 = vmax.f32 %v1739_v51, 0.0  ;;  %v1715_v4 = vadd.f32 %v1659_v39, %v3444_v20  ;;  %v2474_v42 = vadd.f32 %v2473_v60, %v2472_v17  ;;  %v1666_v47 = vpop.f32.mrf.mxu1 }
 0x19c   : > { %v2475_v5 = vpop.f32.mrf.mxu0 }
 0x19d   : > { %1776 = vst.msk [vmem:[%s3494_s19 + $0x20] sm:$0xff] %vm1771_vm1, %v1757_v30  ;;  %v1740_v11 = vadd.f32 %v3487_v0, %v1715_v4  ;;  %v1664_v6 = vadd.f32 %v2474_v42, %v1663_v56  ;;  %v2660_v27 = vpop.f32.mrf.mxu1 }
 0x19e   : > { %v2476_v35 = vpop.f32.mrf.mxu0 }
 0x19f   : > { %v1758_v15 = vmax.f32 %v1740_v11, 0.0  ;;  %v1716_v59 = vadd.f32 %v1664_v6, %v3447_v16  ;;  %v2477_v12 = vadd.f32 %v2476_v35, %v2475_v5  ;;  %v1671_v14 = vpop.f32.mrf.mxu1 }
 0x1a0   : > { %v2478_v28 = vpop.f32.mrf.mxu0 }
 0x1a1   : > { %1777 = vst.msk [vmem:[%s3494_s19 + $0x28] sm:$0xff] %vm1771_vm1, %v1758_v15  ;;  %v1741_v20 = vadd.f32 %v3487_v0, %v1716_v59  ;;  %v1667_v41 = vadd.f32 %v2477_v12, %v1666_v47  ;;  %v2663_v3 = vpop.f32.mrf.mxu1 }
 0x1a2   : > { %v2479_v62 = vpop.f32.mrf.mxu0 }
 0x1a3   : > { %v1759_v2 = vmax.f32 %v1741_v20, 0.0  ;;  %v1717_v21 = vadd.f32 %v1667_v41, %v3450_v34  ;;  %v2480_v22 = vadd.f32 %v2479_v62, %v2478_v28  ;;  %v1674_v36 = vpop.f32.mrf.mxu1 }
 0x1a4   : > { %v2481_v23 = vpop.f32.mrf.mxu0 }
 0x1a5   : > { %1778 = vst.msk [vmem:[%s3494_s19 + $0x30] sm:$0xff] %vm1771_vm1, %v1759_v2  ;;  %v1742_v16 = vadd.f32 %v3487_v0, %v1717_v21  ;;  %v1672_v26 = vadd.f32 %v2480_v22, %v1671_v14  ;;  %v2664_v7 = vpop.f32.mrf.mxu1 }
 0x1a6   : > { %v2482_v53 = vpop.f32.mrf.mxu0 }
 0x1a7   : > { %v1760_v31 = vmax.f32 %v1742_v16, 0.0  ;;  %v1718_v57 = vadd.f32 %v1672_v26, %v3453_v45  ;;  %v2483_v32 = vadd.f32 %v2482_v53, %v2481_v23  ;;  %v1679_v48 = vpop.f32.mrf.mxu1 }
 0x1a8   : > { %v2484_v29 = vpop.f32.mrf.mxu0 }
 0x1a9   : > { %1779 = vst.msk [vmem:[%s3494_s19 + $0x38] sm:$0xff] %vm1771_vm1, %v1760_v31  ;;  %v1743_v34 = vadd.f32 %v3487_v0, %v1718_v57  ;;  %v1675_v13 = vadd.f32 %v2483_v32, %v1674_v36  ;;  %v2667_v37 = vpop.f32.mrf.mxu1 }
 0x1aa   : > { %v2485_v61 = vpop.f32.mrf.mxu0 }
 0x1ab   : > { %v1761_v38 = vmax.f32 %v1743_v34, 0.0  ;;  %v1719_v43 = vadd.f32 %v1675_v13, %v3456_v55  ;;  %v2486_v44 = vadd.f32 %v2485_v61, %v2484_v29  ;;  %v1682_v19 = vpop.f32.mrf.mxu1 }
 0x1ac   : > { %v2487_v58 = vpop.f32.mrf.mxu0 }
 0x1ad   : > { %1780 = vst.msk [vmem:[%s3494_s19 + $0x40] sm:$0xff] %vm1771_vm1, %v1761_v38  ;;  %v1744_v45 = vadd.f32 %v3487_v0, %v1719_v43  ;;  %v1680_v46 = vadd.f32 %v2486_v44, %v1679_v48  ;;  %v2668_v8 = vpop.f32.mrf.mxu1 }
 0x1ae   : > { %v2488_v54 = vpop.f32.mrf.mxu0 }
 0x1af   : > { %v1762_v49 = vmax.f32 %v1744_v45, 0.0  ;;  %v1720_v63 = vadd.f32 %v1680_v46, %v3459_v1  ;;  %v2489_v24 = vadd.f32 %v2488_v54, %v2487_v58  ;;  %v1687_v56 = vpop.f32.mrf.mxu1 }
 0x1b0   : > { %v2490_v17 = vpop.f32.mrf.mxu0 }
 0x1b1   : > { %1781 = vst.msk [vmem:[%s3494_s19 + $0x48] sm:$0xff] %vm1771_vm1, %v1762_v49  ;;  %v1745_v55 = vadd.f32 %v3487_v0, %v1720_v63  ;;  %v1683_v51 = vadd.f32 %v2489_v24, %v1682_v19  ;;  %v2671_v39 = vpop.f32.mrf.mxu1 }
 0x1b2   : > { %v2491_v10 = vpop.f32.mrf.mxu0 }
 0x1b3   : > { %v1763_v60 = vmax.f32 %v1745_v55, 0.0  ;;  %v1721_v30 = vadd.f32 %v1683_v51, %v3462_v9  ;;  %v2492_v4 = vadd.f32 %v2491_v10, %v2490_v17  ;;  %v1690_v42 = vpop.f32.mrf.mxu1 }
 0x1b4   : > { %v2493_v47 = vpop.f32.mrf.mxu0 }
 0x1b5   : > { %1782 = vst.msk [vmem:[%s3494_s19 + $0x50] sm:$0xff] %vm1771_vm1, %v1763_v60  ;;  %v1746_v1 = vadd.f32 %v3487_v0, %v1721_v30  ;;  %v1688_v5 = vadd.f32 %v2492_v4, %v1687_v56  ;;  %v2672_v11 = vpop.f32.mrf.mxu1 }
 0x1b6   : > { %v2494_v6 = vpop.f32.mrf.mxu0 }
 0x1b7   : > { %v1764_v27 = vmax.f32 %v1746_v1, 0.0  ;;  %v1722_v35 = vadd.f32 %v1688_v5, %v3465_v18  ;;  %v2495_v15 = vadd.f32 %v2494_v6, %v2493_v47  ;;  %v1695_v59 = vpop.f32.mrf.mxu1 }
 0x1b8   : > { %v2496_v12 = vpop.f32.mrf.mxu0 }
 0x1b9   : > { %1783 = vst.msk [vmem:[%s3494_s19 + $0x58] sm:$0xff] %vm1771_vm1, %v1764_v27  ;;  %v1747_v9 = vadd.f32 %v3487_v0, %v1722_v35  ;;  %v1691_v14 = vadd.f32 %v2495_v15, %v1690_v42  ;;  %v2675_v28 = vpop.f32.mrf.mxu1 }
 0x1ba   : > { %v2497_v20 = vpop.f32.mrf.mxu0 }
 0x1bb   : > { %v1765_v41 = vmax.f32 %v1747_v9, 0.0  ;;  %v1723_v3 = vadd.f32 %v1691_v14, %v3468_v25  ;;  %v2498_v62 = vadd.f32 %v2497_v20, %v2496_v12  ;;  %v1698_v2 = vpop.f32.mrf.mxu1 }
 0x1bc   : > { %v2499_v21 = vpop.f32.mrf.mxu0 }
 0x1bd   : > { %1784 = vst.msk [vmem:[%s3494_s19 + $0x60] sm:$0xff] %vm1771_vm1, %v1765_v41  ;;  %v1748_v18 = vadd.f32 %v3487_v0, %v1723_v3  ;;  %v1696_v22 = vadd.f32 %v2498_v62, %v1695_v59  ;;  %v2676_v36 = vpop.f32.mrf.mxu1 }
 0x1be   : > { %v2500_v23 = vpop.f32.mrf.mxu0 }
 0x1bf   : > { %v1766_v16 = vmax.f32 %v1748_v18, 0.0  ;;  %v1724_v26 = vadd.f32 %v1696_v22, %v3471_v33  ;;  %v2501_v7 = vadd.f32 %v2500_v23, %v2499_v21  ;;  %v1703_v53 = vpop.f32.mrf.mxu1 }
 0x1c0   : > { %v2502_v31 = vpop.f32.mrf.mxu0 }
 0x1c1   : > { %1785 = vst.msk [vmem:[%s3494_s19 + $0x68] sm:$0xff] %vm1771_vm1, %v1766_v16  ;;  %v1749_v25 = vadd.f32 %v3487_v0, %v1724_v26  ;;  %v1699_v57 = vadd.f32 %v2501_v7, %v1698_v2  ;;  %v2679_v32 = vpop.f32.mrf.mxu1 }
 0x1c2   : > { %v2503_v48 = vpop.f32.mrf.mxu0 }
 0x1c3   : > { %v1767_v29 = vmax.f32 %v1749_v25, 0.0  ;;  %v1725_v34 = vadd.f32 %v1699_v57, %v3475_v40  ;;  %v2504_v13 = vadd.f32 %v2503_v48, %v2502_v31  ;;  %v1706_v37 = vpop.f32.mrf.mxu1 }
 0x1c4   : > { %v2505_v61 = vpop.f32.mrf.mxu0 }
 0x1c5   : > { %1786 = vst.msk [vmem:[%s3494_s19 + $0x70] sm:$0xff] %vm1771_vm1, %v1767_v29  ;;  %v1750_v33 = vadd.f32 %v3487_v0, %v1725_v34  ;;  %v1704_v38 = vadd.f32 %v2504_v13, %v1703_v53  ;;  %v2680_v43 = vpop.f32.mrf.mxu1 }
 0x1c6   : > { %v2506_v44 = vpop.f32.mrf.mxu0 }
 0x1c7   : > { %v1768_v19 = vmax.f32 %v1750_v33, 0.0  ;;  %v1726_v58 = vadd.f32 %v1704_v38, %v3478_v52  ;;  %v2507_v45 = vadd.f32 %v2506_v44, %v2505_v61 }
 0x1c9   : > { %1787 = vst.msk [vmem:[%s3494_s19 + $0x78] sm:$0xff] %vm1771_vm1, %v1768_v19  ;;  %v1751_v40 = vadd.f32 %v3487_v0, %v1726_v58  ;;  %v1707_v46 = vadd.f32 %v2507_v45, %v1706_v37 }
 0x1cb   : > { %v1769_v8 = vmax.f32 %v1751_v40, 0.0  ;;  %v1727_v54 = vadd.f32 %v1707_v46, %v3482_v50 }
 0x1cd   : > { %1788 = vst.msk [vmem:[%s3494_s19 + $0x80] sm:$0xff] %vm1771_vm1, %v1769_v8  ;;  %v1752_v49 = vadd.f32 %v3487_v0, %v1727_v54 }
 0x1cf   : > { %v1770_v63 = vmax.f32 %v1752_v49, 0.0 }
 0x1d1   : > { %1789 = vst.msk [vmem:[%s3494_s19 + $0x88] sm:$0xff] %vm1771_vm1, %v1770_v63 }
 0x1d2 PF: > { %s13_s16 = sadd.s32 1, %s2835_s16   ;;  %s3585_s12 = smov %s2827_s14 }
 0x1d3   : > { %p10_p7 = scmp.ge.s32.totalorder %s13_s16, 6   ;;  %s3586_s13 = smov %s2831_s15 }
 0x1d4   : > { %s3587_s14 = smov %s3590_s17  ;;  %s3588_s15 = smov %s3594_s18 }
 0x1d5   :  { %12 = sbr.rel (!%p10_p7) target bundleno = 3 (0x3), region = 79 }

</bundles_post_ra>
